<compile_context>
chip_gen: v5e
topology: v5e:2x2
jax: 0.10.0
libtpu: 0.0.40
codegen_flags: <defaults>
</compile_context>

<pallas_src>
import functools

import jax
import jax.numpy as jnp
from jax import lax
from jax.experimental import pallas as pl
from jax.experimental.pallas import tpu as pltpu


def _round_half_away_from_zero(x):
    # torchvision RoIPool uses std::round (half away from zero), not
    # jnp.round's half-to-even.
    return jnp.where(x >= 0, jnp.floor(x + 0.5), jnp.ceil(x - 0.5))


def _ceil_div(a, b):
    return -(-a // b)


def _pick_roi_block(num_rois, max_rb=16):
    # Largest divisor of num_rois <= max_rb.  RoIs are flattened row-major from
    # (n, num_rois) and roi_indices is constant per image row in the standard
    # faster_rcnn pipeline, so every block of RB consecutive RoIs shares one
    # image and one resident feature-map block serves the whole grid step.
    rb = 1
    for d in range(1, min(num_rois, max_rb) + 1):
        if num_rois % d == 0:
            rb = d
    return rb


# ---------------------------------------------------------------------------
# Kernel 1: RoI max-pool + fused bin-average (the stand-in classifier's
# avgpool).  RB RoIs per grid step; the per-image feature block is selected in
# the BlockSpec index_map via the scalar-prefetched roi image indices.
# Only the (R, 1, C) bin-mean is written back to HBM.
# ---------------------------------------------------------------------------
def _roi_pool_kernel(idx_ref, hs_ref, he_ref, ws_ref, we_ref, x_ref, mean_ref,
                     *, RB, P, BH):
    del idx_ref  # consumed only by the BlockSpec index_map
    _, H, W, C = x_ref.shape
    fdtype = x_ref.dtype
    NEG = jnp.array(-jnp.inf, dtype=fdtype)
    inv_bins = 1.0 / float(P * P)
    # (W, 1) sublane iota, hoisted out of every loop (JAX does not CSE it).
    w_iota = lax.broadcasted_iota(jnp.int32, (W, 1), 0)
    g = pl.program_id(0)

    def roi_body(rb, carry):
        r = g * RB + rb
        acc = jnp.zeros((1, C), jnp.float32)                   # f32 mean acc
        for ph in range(P):                                    # static unroll
            hs = hs_ref[r * P + ph]
            he = he_ref[r * P + ph]
            # BH-row window that always covers [hs, he) and stays in bounds.
            h0 = jnp.minimum(hs, H - BH)
            row = jnp.full((W, C), NEG, dtype=fdtype)          # max over H
            for i in range(BH):                                # static unroll
                h = h0 + i
                valid_h = (h >= hs) & (h < he)                 # scalar pred
                xi = x_ref[0, h]                               # (W, C) row
                row = jnp.where(valid_h, jnp.maximum(row, xi), row)
            for pw in range(P):                                # static unroll
                ws = ws_ref[r * P + pw]
                we = we_ref[r * P + pw]
                wmask = (w_iota >= ws) & (w_iota < we)         # (W, 1)
                bin_max = jnp.max(jnp.where(wmask, row, NEG),
                                  axis=0, keepdims=True)       # (1, C)
                # torchvision: empty bin (fully clipped away) -> 0
                is_empty = (he <= hs) | (we <= ws)
                acc = acc + jnp.where(is_empty, 0.0,
                                      bin_max.astype(jnp.float32))
        mean_ref[rb] = acc * inv_bins                          # fused avgpool
        return carry

    lax.fori_loop(0, RB, roi_body, 0)


def roi_pool(x_nhwc, roi_img_idx, h_start, h_end, w_start, w_end,
             roi_size, roi_block):
    n, H, W, C = x_nhwc.shape
    R = roi_img_idx.shape[0]
    RB = roi_block
    assert R % RB == 0
    P = roi_size
    # Static window height: covers any RoI lying (approximately) inside the
    # feature map; +2 rows of margin absorb boxes that round onto the border.
    BH = max(1, min(H, _ceil_div(H + 1, P) + 2))
    kernel = functools.partial(_roi_pool_kernel, RB=RB, P=P, BH=BH)

    grid_spec = pltpu.PrefetchScalarGridSpec(
        num_scalar_prefetch=5,
        grid=(R // RB,),
        in_specs=[pl.BlockSpec(
            (1, H, W, C),
            lambda g, idx, hs, he, ws, we: (idx[g * RB], 0, 0, 0))],
        out_specs=pl.BlockSpec(
            (RB, 1, C), lambda g, idx, hs, he, ws, we: (g, 0, 0)),
    )
    mean = pl.pallas_call(
        kernel,
        grid_spec=grid_spec,
        out_shape=jax.ShapeDtypeStruct((R, 1, C), jnp.float32),
        compiler_params=pltpu.CompilerParams(
            # RB-blocks are image-aligned, so a megacore split keeps each
            # core's feature-map DMAs within its own images.
            dimension_semantics=("parallel",),
            vmem_limit_bytes=32 * 1024 * 1024),
    )(roi_img_idx, h_start, h_end, w_start, w_end, x_nhwc)
    return mean.reshape(R, C)


# ---------------------------------------------------------------------------
# Kernel 2: classifier stand-in (Linear C->2048 + ReLU on the fused bin-mean)
# followed by the fused cls_loc/score head.  Tiled over R, weights resident
# (constant index_maps), bf16 matmuls with f32 accumulation, lane-padded output.
# TODO(synk): the real `classifier` (ResNet50 layer4 + avgpool) is injected
# from outside Resnet50RoIHead; a deterministic avgpool+Linear(2048)+ReLU
# stand-in is used since its definition is not part of this module.
# ---------------------------------------------------------------------------
def _head_kernel(feat_ref, wf_ref, bf_ref, wh_ref, bh_ref, out_ref):
    feat = feat_ref[...].astype(jnp.bfloat16)                  # (Rt, C)
    fc7 = jnp.dot(feat, wf_ref[...], preferred_element_type=jnp.float32)
    fc7 = jnp.maximum(fc7 + bf_ref[...], 0.0)                  # (Rt, hidden)
    out = jnp.dot(fc7.astype(jnp.bfloat16), wh_ref[...],
                  preferred_element_type=jnp.float32)
    out_ref[...] = out + bh_ref[...]


def roi_head(feat_mean, head_params, n_class):
    R, C = feat_mean.shape
    w_feat = head_params["w_feat"]
    b_feat = head_params["b_feat"]
    w_head = head_params["w_head"]
    b_head = head_params["b_head"]
    hidden = w_feat.shape[1]
    n_pad = w_head.shape[1]

    # R tile: up to 256 (matches 256-wide MXU on v6e/v7x; still fine on v5e).
    r_pad8 = _ceil_div(R, 8) * 8
    if r_pad8 <= 256:
        r_t = r_pad = r_pad8
    else:
        r_t = 256
        r_pad = _ceil_div(R, 256) * 256
    feat_p = jnp.pad(feat_mean, ((0, r_pad - R), (0, 0)))

    out = pl.pallas_call(
        _head_kernel,
        grid=(r_pad // r_t,),
        in_specs=[pl.BlockSpec((r_t, C), lambda i: (i, 0)),
                  # Constant index_maps keep the weights VMEM-resident across
                  # grid steps.  TODO(synk): on v7x use pipeline_mode=
                  # pl.Buffered(1) here to drop the redundant second buffer.
                  pl.BlockSpec((C, hidden), lambda i: (0, 0)),
                  pl.BlockSpec((1, hidden), lambda i: (0, 0)),
                  pl.BlockSpec((hidden, n_pad), lambda i: (0, 0)),
                  pl.BlockSpec((1, n_pad), lambda i: (0, 0))],
        out_specs=pl.BlockSpec((r_t, n_pad), lambda i: (i, 0)),
        out_shape=jax.ShapeDtypeStruct((r_pad, n_pad), jnp.float32),
        compiler_params=pltpu.CompilerParams(
            dimension_semantics=("parallel",),
            vmem_limit_bytes=32 * 1024 * 1024),
    )(feat_p, w_feat, b_feat, w_head, b_head)

    locs = out[:R, :n_class * 4]
    scores = out[:R, n_class * 4:n_class * 5]
    return locs, scores


# ---------------------------------------------------------------------------
# Full forward, mirroring Resnet50RoIHead.forward
# ---------------------------------------------------------------------------
def resnet50_roi_head_forward(x, rois, roi_indices, img_size, head_params,
                              roi_size, n_class, feat_dtype=jnp.bfloat16):
    n, C, Hf, Wf = x.shape
    P = roi_size
    rois_flat = rois.reshape(-1, 4).astype(jnp.float32)
    idx_flat = roi_indices.reshape(-1).astype(jnp.int32)

    # rois_feature_map: scale image-space boxes to feature-map space (module
    # glue), then quantize like torchvision RoIPool (round half away from zero,
    # spatial_scale == 1 because boxes are already in feature coordinates).
    scale = jnp.array([Wf / img_size[1], Hf / img_size[0],
                       Wf / img_size[1], Hf / img_size[0]], jnp.float32)
    b = _round_half_away_from_zero(rois_flat * scale[None, :])
    x1, y1, x2, y2 = b[:, 0], b[:, 1], b[:, 2], b[:, 3]
    roi_w = jnp.maximum(x2 - x1 + 1.0, 1.0)
    roi_h = jnp.maximum(y2 - y1 + 1.0, 1.0)
    bin_w = roi_w / float(P)
    bin_h = roi_h / float(P)

    # Precompute integer bin windows once (R, P); they ride into SMEM via
    # scalar prefetch so the kernel does no float box math.
    pp = jnp.arange(P, dtype=jnp.float32)[None, :]
    h_start = jnp.clip(jnp.floor(bin_h[:, None] * pp) + y1[:, None], 0.0, float(Hf))
    h_end = jnp.clip(jnp.ceil(bin_h[:, None] * (pp + 1.0)) + y1[:, None], 0.0, float(Hf))
    w_start = jnp.clip(jnp.floor(bin_w[:, None] * pp) + x1[:, None], 0.0, float(Wf))
    w_end = jnp.clip(jnp.ceil(bin_w[:, None] * (pp + 1.0)) + x1[:, None], 0.0, float(Wf))
    h_start = h_start.astype(jnp.int32).reshape(-1)
    h_end = h_end.astype(jnp.int32).reshape(-1)
    w_start = w_start.astype(jnp.int32).reshape(-1)
    w_end = w_end.astype(jnp.int32).reshape(-1)

    # Channel-last + (default) bf16 feature map: lane-dense, half the DMA.
    x_nhwc = jnp.transpose(x, (0, 2, 3, 1)).astype(feat_dtype)

    rb = _pick_roi_block(rois.shape[1])
    pooled_mean = roi_pool(x_nhwc, idx_flat, h_start, h_end, w_start, w_end,
                           roi_size, rb)                        # (R, C) f32
    locs, scores = roi_head(pooled_mean, head_params, n_class)  # (R,4K),(R,K)

    roi_cls_locs = locs.reshape(n, -1, n_class * 4)
    roi_scores = scores.reshape(n, -1, n_class)
    return roi_cls_locs, roi_scores


def init_params(key, C, n_class, hidden=2048):
    k1, k2, k3 = jax.random.split(key, 3)
    return {
        # classifier stand-in weights (see TODO above _head_kernel)
        "w_feat": jax.random.normal(k1, (C, hidden), jnp.float32) * 0.01,
        "b_feat": jnp.zeros((hidden,), jnp.float32),
        # cls_loc: normal_init(mean=0, std=0.001), bias zero
        "w_loc": jax.random.normal(k2, (hidden, n_class * 4), jnp.float32) * 0.001,
        "b_loc": jnp.zeros((n_class * 4,), jnp.float32),
        # score: normal_init(mean=0, std=0.01), bias zero
        "w_score": jax.random.normal(k3, (hidden, n_class), jnp.float32) * 0.01,
        "b_score": jnp.zeros((n_class,), jnp.float32),
    }


def prepare_head_params(params, n_class):
    """One-time fuse/pad/cast of the head weights (kept out of the forward)."""
    n_out = n_class * 5
    n_pad = _ceil_div(n_out, 128) * 128
    w_head = jnp.concatenate([params["w_loc"], params["w_score"]], axis=1)
    b_head = jnp.concatenate([params["b_loc"], params["b_score"]], axis=0)[None, :]
    return {
        "w_feat": params["w_feat"].astype(jnp.bfloat16),
        "b_feat": params["b_feat"][None, :].astype(jnp.float32),
        "w_head": jnp.pad(w_head, ((0, 0), (0, n_pad - n_out))).astype(jnp.bfloat16),
        "b_head": jnp.pad(b_head, ((0, 0), (0, n_pad - n_out))).astype(jnp.float32),
    }


if __name__ == "__main__":
    n, C, Hf, Wf = 2, 32, 16, 16
    num_rois = 8
    roi_size = 4
    n_class = 5
    img_size = (64, 64)   # (img_h, img_w)

    key = jax.random.PRNGKey(0)
    kx, kb, kp = jax.random.split(key, 3)

    x = jax.random.normal(kx, (n, C, Hf, Wf), jnp.float32)

    # random boxes in image coordinates, guaranteed x1<=x2, y1<=y2
    pts = jax.random.uniform(kb, (n, num_rois, 4), jnp.float32,
                             minval=0.0, maxval=float(img_size[1]))
    bx1 = jnp.minimum(pts[..., 0], pts[..., 1])
    bx2 = jnp.maximum(pts[..., 0], pts[..., 1])
    by1 = jnp.minimum(pts[..., 2], pts[..., 3])
    by2 = jnp.maximum(pts[..., 2], pts[..., 3])
    rois = jnp.stack([bx1, by1, bx2, by2], axis=-1)            # (n, num_rois, 4)
    roi_indices = jnp.broadcast_to(jnp.arange(n, dtype=jnp.int32)[:, None],
                                   (n, num_rois))

    head_params = prepare_head_params(init_params(kp, C, n_class), n_class)

    roi_cls_locs, roi_scores = resnet50_roi_head_forward(
        x, rois, roi_indices, img_size, head_params, roi_size, n_class)
    jax.block_until_ready((roi_cls_locs, roi_scores))

    assert roi_cls_locs.shape == (n, num_rois, n_class * 4)
    assert roi_scores.shape == (n, num_rois, n_class)
    assert bool(jnp.all(jnp.isfinite(roi_cls_locs)))
    assert bool(jnp.all(jnp.isfinite(roi_scores)))
    print("KERNEL_OK")
</pallas_src>

<mosaic_0001>
module attributes {stable_mosaic.version = 11 : i64} {
  func.func @_roi_pool_kernel(%arg0: i32, %arg1: memref<16xi32, #tpu.memory_space<smem>>, %arg2: memref<64xi32, #tpu.memory_space<smem>>, %arg3: memref<64xi32, #tpu.memory_space<smem>>, %arg4: memref<64xi32, #tpu.memory_space<smem>>, %arg5: memref<64xi32, #tpu.memory_space<smem>>, %arg6: memref<1x16x16x32xbf16, #tpu.memory_space<vmem>>, %arg7: memref<8x1x32xf32, #tpu.memory_space<vmem>>) attributes {dimension_semantics = [#tpu.dimension_semantics<parallel>], iteration_bounds = array<i64: 2>, scalar_prefetch = 5 : i64, scratch_operands = 0 : i64, tpu.core_type = #tpu.core_type<tc>, window_params = [{transform_indices = @transform_0, window_bounds = array<i64: 1, 16, 16, 32>}, {transform_indices = @transform_1, window_bounds = array<i64: 8, 1, 32>}]} {
    %0 = tpu.iota {dimensions = array<i32: 0>} : vector<16x1xi32>
    %cst = arith.constant 0xFF80 : bf16
    %c0_i32 = arith.constant 0 : i32
    %c8_i32 = arith.constant 8 : i32
    %1 = arith.addi %c0_i32, %c8_i32 : i32
    %c1_i32 = arith.constant 1 : i32
    scf.for %arg8 = %c0_i32 to %1 step %c1_i32  : i32 {
      %c8_i32_1 = arith.constant 8 : i32
      %2 = arith.muli %arg0, %c8_i32_1 : i32
      %3 = arith.addi %2, %arg8 : i32
      %cst_2 = arith.constant 0.000000e+00 : f32
      %4 = vector.broadcast %cst_2 : f32 to vector<1x32xf32>
      %c4_i32 = arith.constant 4 : i32
      %5 = arith.muli %3, %c4_i32 : i32
      %c0_i32_3 = arith.constant 0 : i32
      %6 = arith.addi %5, %c0_i32_3 : i32
      %7 = arith.index_cast %6 : i32 to index
      %8 = memref.load %arg2[%7] : memref<64xi32, #tpu.memory_space<smem>>
      %c4_i32_4 = arith.constant 4 : i32
      %9 = arith.muli %3, %c4_i32_4 : i32
      %c0_i32_5 = arith.constant 0 : i32
      %10 = arith.addi %9, %c0_i32_5 : i32
      %11 = arith.index_cast %10 : i32 to index
      %12 = memref.load %arg3[%11] : memref<64xi32, #tpu.memory_space<smem>>
      %c9_i32 = arith.constant 9 : i32
      %13 = arith.minsi %8, %c9_i32 : i32
      %14 = vector.broadcast %cst : bf16 to vector<16x32xbf16>
      %c0_i32_6 = arith.constant 0 : i32
      %15 = arith.addi %13, %c0_i32_6 : i32
      %16 = arith.cmpi sge, %15, %8 : i32
      %17 = arith.cmpi slt, %15, %12 : i32
      %18 = arith.andi %16, %17 : i1
      %c0 = arith.constant 0 : index
      %19 = arith.index_cast %15 : i32 to index
      %c0_7 = arith.constant 0 : index
      %c0_8 = arith.constant 0 : index
      %20 = vector.load %arg6[%c0, %19, %c0_7, %c0_8] : memref<1x16x16x32xbf16, #tpu.memory_space<vmem>>, vector<1x1x16x32xbf16>
      %21 = vector.shape_cast %20 : vector<1x1x16x32xbf16> to vector<16x32xbf16>
      %22 = arith.maximumf %14, %21 : vector<16x32xbf16>
      %23 = arith.select %18, %22, %14 : vector<16x32xbf16>
      %c1_i32_9 = arith.constant 1 : i32
      %24 = arith.addi %13, %c1_i32_9 : i32
      %25 = arith.cmpi sge, %24, %8 : i32
      %26 = arith.cmpi slt, %24, %12 : i32
      %27 = arith.andi %25, %26 : i1
      %c0_10 = arith.constant 0 : index
      %28 = arith.index_cast %24 : i32 to index
      %c0_11 = arith.constant 0 : index
      %c0_12 = arith.constant 0 : index
      %29 = vector.load %arg6[%c0_10, %28, %c0_11, %c0_12] : memref<1x16x16x32xbf16, #tpu.memory_space<vmem>>, vector<1x1x16x32xbf16>
      %30 = vector.shape_cast %29 : vector<1x1x16x32xbf16> to vector<16x32xbf16>
      %31 = arith.maximumf %23, %30 : vector<16x32xbf16>
      %32 = arith.select %27, %31, %23 : vector<16x32xbf16>
      %c2_i32 = arith.constant 2 : i32
      %33 = arith.addi %13, %c2_i32 : i32
      %34 = arith.cmpi sge, %33, %8 : i32
      %35 = arith.cmpi slt, %33, %12 : i32
      %36 = arith.andi %34, %35 : i1
      %c0_13 = arith.constant 0 : index
      %37 = arith.index_cast %33 : i32 to index
      %c0_14 = arith.constant 0 : index
      %c0_15 = arith.constant 0 : index
      %38 = vector.load %arg6[%c0_13, %37, %c0_14, %c0_15] : memref<1x16x16x32xbf16, #tpu.memory_space<vmem>>, vector<1x1x16x32xbf16>
      %39 = vector.shape_cast %38 : vector<1x1x16x32xbf16> to vector<16x32xbf16>
      %40 = arith.maximumf %32, %39 : vector<16x32xbf16>
      %41 = arith.select %36, %40, %32 : vector<16x32xbf16>
      %c3_i32 = arith.constant 3 : i32
      %42 = arith.addi %13, %c3_i32 : i32
      %43 = arith.cmpi sge, %42, %8 : i32
      %44 = arith.cmpi slt, %42, %12 : i32
      %45 = arith.andi %43, %44 : i1
      %c0_16 = arith.constant 0 : index
      %46 = arith.index_cast %42 : i32 to index
      %c0_17 = arith.constant 0 : index
      %c0_18 = arith.constant 0 : index
      %47 = vector.load %arg6[%c0_16, %46, %c0_17, %c0_18] : memref<1x16x16x32xbf16, #tpu.memory_space<vmem>>, vector<1x1x16x32xbf16>
      %48 = vector.shape_cast %47 : vector<1x1x16x32xbf16> to vector<16x32xbf16>
      %49 = arith.maximumf %41, %48 : vector<16x32xbf16>
      %50 = arith.select %45, %49, %41 : vector<16x32xbf16>
      %c4_i32_19 = arith.constant 4 : i32
      %51 = arith.addi %13, %c4_i32_19 : i32
      %52 = arith.cmpi sge, %51, %8 : i32
      %53 = arith.cmpi slt, %51, %12 : i32
      %54 = arith.andi %52, %53 : i1
      %c0_20 = arith.constant 0 : index
      %55 = arith.index_cast %51 : i32 to index
      %c0_21 = arith.constant 0 : index
      %c0_22 = arith.constant 0 : index
      %56 = vector.load %arg6[%c0_20, %55, %c0_21, %c0_22] : memref<1x16x16x32xbf16, #tpu.memory_space<vmem>>, vector<1x1x16x32xbf16>
      %57 = vector.shape_cast %56 : vector<1x1x16x32xbf16> to vector<16x32xbf16>
      %58 = arith.maximumf %50, %57 : vector<16x32xbf16>
      %59 = arith.select %54, %58, %50 : vector<16x32xbf16>
      %c5_i32 = arith.constant 5 : i32
      %60 = arith.addi %13, %c5_i32 : i32
      %61 = arith.cmpi sge, %60, %8 : i32
      %62 = arith.cmpi slt, %60, %12 : i32
      %63 = arith.andi %61, %62 : i1
      %c0_23 = arith.constant 0 : index
      %64 = arith.index_cast %60 : i32 to index
      %c0_24 = arith.constant 0 : index
      %c0_25 = arith.constant 0 : index
      %65 = vector.load %arg6[%c0_23, %64, %c0_24, %c0_25] : memref<1x16x16x32xbf16, #tpu.memory_space<vmem>>, vector<1x1x16x32xbf16>
      %66 = vector.shape_cast %65 : vector<1x1x16x32xbf16> to vector<16x32xbf16>
      %67 = arith.maximumf %59, %66 : vector<16x32xbf16>
      %68 = arith.select %63, %67, %59 : vector<16x32xbf16>
      %c6_i32 = arith.constant 6 : i32
      %69 = arith.addi %13, %c6_i32 : i32
      %70 = arith.cmpi sge, %69, %8 : i32
      %71 = arith.cmpi slt, %69, %12 : i32
      %72 = arith.andi %70, %71 : i1
      %c0_26 = arith.constant 0 : index
      %73 = arith.index_cast %69 : i32 to index
      %c0_27 = arith.constant 0 : index
      %c0_28 = arith.constant 0 : index
      %74 = vector.load %arg6[%c0_26, %73, %c0_27, %c0_28] : memref<1x16x16x32xbf16, #tpu.memory_space<vmem>>, vector<1x1x16x32xbf16>
      %75 = vector.shape_cast %74 : vector<1x1x16x32xbf16> to vector<16x32xbf16>
      %76 = arith.maximumf %68, %75 : vector<16x32xbf16>
      %77 = arith.select %72, %76, %68 : vector<16x32xbf16>
      %c4_i32_29 = arith.constant 4 : i32
      %78 = arith.muli %3, %c4_i32_29 : i32
      %c0_i32_30 = arith.constant 0 : i32
      %79 = arith.addi %78, %c0_i32_30 : i32
      %80 = arith.index_cast %79 : i32 to index
      %81 = memref.load %arg4[%80] : memref<64xi32, #tpu.memory_space<smem>>
      %c4_i32_31 = arith.constant 4 : i32
      %82 = arith.muli %3, %c4_i32_31 : i32
      %c0_i32_32 = arith.constant 0 : i32
      %83 = arith.addi %82, %c0_i32_32 : i32
      %84 = arith.index_cast %83 : i32 to index
      %85 = memref.load %arg5[%84] : memref<64xi32, #tpu.memory_space<smem>>
      %86 = vector.broadcast %81 : i32 to vector<16x1xi32>
      %87 = arith.cmpi sge, %0, %86 : vector<16x1xi32>
      %88 = vector.broadcast %85 : i32 to vector<16x1xi32>
      %89 = arith.cmpi slt, %0, %88 : vector<16x1xi32>
      %90 = arith.andi %87, %89 : vector<16x1xi1>
      %91 = vector.shape_cast %90 : vector<16x1xi1> to vector<16x1xi1>
      %92 = vector.broadcast %91 : vector<16x1xi1> to vector<16x32xi1>
      %93 = vector.broadcast %cst : bf16 to vector<16x32xbf16>
      %94 = arith.select %92, %77, %93 : vector<16x32xi1>, vector<16x32xbf16>
      %cst_33 = arith.constant dense<0xFF80> : vector<32xbf16>
      %95 = vector.multi_reduction <maximumf>, %94, %cst_33 [0] : vector<16x32xbf16> to vector<32xbf16>
      %96 = vector.shape_cast %95 : vector<32xbf16> to vector<1x32xbf16>
      %97 = arith.cmpi sle, %12, %8 : i32
      %98 = arith.cmpi sle, %85, %81 : i32
      %99 = arith.ori %97, %98 : i1
      %100 = arith.extf %96 : vector<1x32xbf16> to vector<1x32xf32>
      %cst_34 = arith.constant 0.000000e+00 : f32
      %101 = vector.broadcast %cst_34 : f32 to vector<1x32xf32>
      %102 = arith.select %99, %101, %100 : vector<1x32xf32>
      %103 = arith.addf %4, %102 : vector<1x32xf32>
      %c4_i32_35 = arith.constant 4 : i32
      %104 = arith.muli %3, %c4_i32_35 : i32
      %c1_i32_36 = arith.constant 1 : i32
      %105 = arith.addi %104, %c1_i32_36 : i32
      %106 = arith.index_cast %105 : i32 to index
      %107 = memref.load %arg4[%106] : memref<64xi32, #tpu.memory_space<smem>>
      %c4_i32_37 = arith.constant 4 : i32
      %108 = arith.muli %3, %c4_i32_37 : i32
      %c1_i32_38 = arith.constant 1 : i32
      %109 = arith.addi %108, %c1_i32_38 : i32
      %110 = arith.index_cast %109 : i32 to index
      %111 = memref.load %arg5[%110] : memref<64xi32, #tpu.memory_space<smem>>
      %112 = vector.broadcast %107 : i32 to vector<16x1xi32>
      %113 = arith.cmpi sge, %0, %112 : vector<16x1xi32>
      %114 = vector.broadcast %111 : i32 to vector<16x1xi32>
      %115 = arith.cmpi slt, %0, %114 : vector<16x1xi32>
      %116 = arith.andi %113, %115 : vector<16x1xi1>
      %117 = vector.shape_cast %116 : vector<16x1xi1> to vector<16x1xi1>
      %118 = vector.broadcast %117 : vector<16x1xi1> to vector<16x32xi1>
      %119 = vector.broadcast %cst : bf16 to vector<16x32xbf16>
      %120 = arith.select %118, %77, %119 : vector<16x32xi1>, vector<16x32xbf16>
      %cst_39 = arith.constant dense<0xFF80> : vector<32xbf16>
      %121 = vector.multi_reduction <maximumf>, %120, %cst_39 [0] : vector<16x32xbf16> to vector<32xbf16>
      %122 = vector.shape_cast %121 : vector<32xbf16> to vector<1x32xbf16>
      %123 = arith.cmpi sle, %12, %8 : i32
      %124 = arith.cmpi sle, %111, %107 : i32
      %125 = arith.ori %123, %124 : i1
      %126 = arith.extf %122 : vector<1x32xbf16> to vector<1x32xf32>
      %cst_40 = arith.constant 0.000000e+00 : f32
      %127 = vector.broadcast %cst_40 : f32 to vector<1x32xf32>
      %128 = arith.select %125, %127, %126 : vector<1x32xf32>
      %129 = arith.addf %103, %128 : vector<1x32xf32>
      %c4_i32_41 = arith.constant 4 : i32
      %130 = arith.muli %3, %c4_i32_41 : i32
      %c2_i32_42 = arith.constant 2 : i32
      %131 = arith.addi %130, %c2_i32_42 : i32
      %132 = arith.index_cast %131 : i32 to index
      %133 = memref.load %arg4[%132] : memref<64xi32, #tpu.memory_space<smem>>
      %c4_i32_43 = arith.constant 4 : i32
      %134 = arith.muli %3, %c4_i32_43 : i32
      %c2_i32_44 = arith.constant 2 : i32
      %135 = arith.addi %134, %c2_i32_44 : i32
      %136 = arith.index_cast %135 : i32 to index
      %137 = memref.load %arg5[%136] : memref<64xi32, #tpu.memory_space<smem>>
      %138 = vector.broadcast %133 : i32 to vector<16x1xi32>
      %139 = arith.cmpi sge, %0, %138 : vector<16x1xi32>
      %140 = vector.broadcast %137 : i32 to vector<16x1xi32>
      %141 = arith.cmpi slt, %0, %140 : vector<16x1xi32>
      %142 = arith.andi %139, %141 : vector<16x1xi1>
      %143 = vector.shape_cast %142 : vector<16x1xi1> to vector<16x1xi1>
      %144 = vector.broadcast %143 : vector<16x1xi1> to vector<16x32xi1>
      %145 = vector.broadcast %cst : bf16 to vector<16x32xbf16>
      %146 = arith.select %144, %77, %145 : vector<16x32xi1>, vector<16x32xbf16>
      %cst_45 = arith.constant dense<0xFF80> : vector<32xbf16>
      %147 = vector.multi_reduction <maximumf>, %146, %cst_45 [0] : vector<16x32xbf16> to vector<32xbf16>
      %148 = vector.shape_cast %147 : vector<32xbf16> to vector<1x32xbf16>
      %149 = arith.cmpi sle, %12, %8 : i32
      %150 = arith.cmpi sle, %137, %133 : i32
      %151 = arith.ori %149, %150 : i1
      %152 = arith.extf %148 : vector<1x32xbf16> to vector<1x32xf32>
      %cst_46 = arith.constant 0.000000e+00 : f32
      %153 = vector.broadcast %cst_46 : f32 to vector<1x32xf32>
      %154 = arith.select %151, %153, %152 : vector<1x32xf32>
      %155 = arith.addf %129, %154 : vector<1x32xf32>
      %c4_i32_47 = arith.constant 4 : i32
      %156 = arith.muli %3, %c4_i32_47 : i32
      %c3_i32_48 = arith.constant 3 : i32
      %157 = arith.addi %156, %c3_i32_48 : i32
      %158 = arith.index_cast %157 : i32 to index
      %159 = memref.load %arg4[%158] : memref<64xi32, #tpu.memory_space<smem>>
      %c4_i32_49 = arith.constant 4 : i32
      %160 = arith.muli %3, %c4_i32_49 : i32
      %c3_i32_50 = arith.constant 3 : i32
      %161 = arith.addi %160, %c3_i32_50 : i32
      %162 = arith.index_cast %161 : i32 to index
      %163 = memref.load %arg5[%162] : memref<64xi32, #tpu.memory_space<smem>>
      %164 = vector.broadcast %159 : i32 to vector<16x1xi32>
      %165 = arith.cmpi sge, %0, %164 : vector<16x1xi32>
      %166 = vector.broadcast %163 : i32 to vector<16x1xi32>
      %167 = arith.cmpi slt, %0, %166 : vector<16x1xi32>
      %168 = arith.andi %165, %167 : vector<16x1xi1>
      %169 = vector.shape_cast %168 : vector<16x1xi1> to vector<16x1xi1>
      %170 = vector.broadcast %169 : vector<16x1xi1> to vector<16x32xi1>
      %171 = vector.broadcast %cst : bf16 to vector<16x32xbf16>
      %172 = arith.select %170, %77, %171 : vector<16x32xi1>, vector<16x32xbf16>
      %cst_51 = arith.constant dense<0xFF80> : vector<32xbf16>
      %173 = vector.multi_reduction <maximumf>, %172, %cst_51 [0] : vector<16x32xbf16> to vector<32xbf16>
      %174 = vector.shape_cast %173 : vector<32xbf16> to vector<1x32xbf16>
      %175 = arith.cmpi sle, %12, %8 : i32
      %176 = arith.cmpi sle, %163, %159 : i32
      %177 = arith.ori %175, %176 : i1
      %178 = arith.extf %174 : vector<1x32xbf16> to vector<1x32xf32>
      %cst_52 = arith.constant 0.000000e+00 : f32
      %179 = vector.broadcast %cst_52 : f32 to vector<1x32xf32>
      %180 = arith.select %177, %179, %178 : vector<1x32xf32>
      %181 = arith.addf %155, %180 : vector<1x32xf32>
      %c4_i32_53 = arith.constant 4 : i32
      %182 = arith.muli %3, %c4_i32_53 : i32
      %c1_i32_54 = arith.constant 1 : i32
      %183 = arith.addi %182, %c1_i32_54 : i32
      %184 = arith.index_cast %183 : i32 to index
      %185 = memref.load %arg2[%184] : memref<64xi32, #tpu.memory_space<smem>>
      %c4_i32_55 = arith.constant 4 : i32
      %186 = arith.muli %3, %c4_i32_55 : i32
      %c1_i32_56 = arith.constant 1 : i32
      %187 = arith.addi %186, %c1_i32_56 : i32
      %188 = arith.index_cast %187 : i32 to index
      %189 = memref.load %arg3[%188] : memref<64xi32, #tpu.memory_space<smem>>
      %c9_i32_57 = arith.constant 9 : i32
      %190 = arith.minsi %185, %c9_i32_57 : i32
      %191 = vector.broadcast %cst : bf16 to vector<16x32xbf16>
      %c0_i32_58 = arith.constant 0 : i32
      %192 = arith.addi %190, %c0_i32_58 : i32
      %193 = arith.cmpi sge, %192, %185 : i32
      %194 = arith.cmpi slt, %192, %189 : i32
      %195 = arith.andi %193, %194 : i1
      %c0_59 = arith.constant 0 : index
      %196 = arith.index_cast %192 : i32 to index
      %c0_60 = arith.constant 0 : index
      %c0_61 = arith.constant 0 : index
      %197 = vector.load %arg6[%c0_59, %196, %c0_60, %c0_61] : memref<1x16x16x32xbf16, #tpu.memory_space<vmem>>, vector<1x1x16x32xbf16>
      %198 = vector.shape_cast %197 : vector<1x1x16x32xbf16> to vector<16x32xbf16>
      %199 = arith.maximumf %191, %198 : vector<16x32xbf16>
      %200 = arith.select %195, %199, %191 : vector<16x32xbf16>
      %c1_i32_62 = arith.constant 1 : i32
      %201 = arith.addi %190, %c1_i32_62 : i32
      %202 = arith.cmpi sge, %201, %185 : i32
      %203 = arith.cmpi slt, %201, %189 : i32
      %204 = arith.andi %202, %203 : i1
      %c0_63 = arith.constant 0 : index
      %205 = arith.index_cast %201 : i32 to index
      %c0_64 = arith.constant 0 : index
      %c0_65 = arith.constant 0 : index
      %206 = vector.load %arg6[%c0_63, %205, %c0_64, %c0_65] : memref<1x16x16x32xbf16, #tpu.memory_space<vmem>>, vector<1x1x16x32xbf16>
      %207 = vector.shape_cast %206 : vector<1x1x16x32xbf16> to vector<16x32xbf16>
      %208 = arith.maximumf %200, %207 : vector<16x32xbf16>
      %209 = arith.select %204, %208, %200 : vector<16x32xbf16>
      %c2_i32_66 = arith.constant 2 : i32
      %210 = arith.addi %190, %c2_i32_66 : i32
      %211 = arith.cmpi sge, %210, %185 : i32
      %212 = arith.cmpi slt, %210, %189 : i32
      %213 = arith.andi %211, %212 : i1
      %c0_67 = arith.constant 0 : index
      %214 = arith.index_cast %210 : i32 to index
      %c0_68 = arith.constant 0 : index
      %c0_69 = arith.constant 0 : index
      %215 = vector.load %arg6[%c0_67, %214, %c0_68, %c0_69] : memref<1x16x16x32xbf16, #tpu.memory_space<vmem>>, vector<1x1x16x32xbf16>
      %216 = vector.shape_cast %215 : vector<1x1x16x32xbf16> to vector<16x32xbf16>
      %217 = arith.maximumf %209, %216 : vector<16x32xbf16>
      %218 = arith.select %213, %217, %209 : vector<16x32xbf16>
      %c3_i32_70 = arith.constant 3 : i32
      %219 = arith.addi %190, %c3_i32_70 : i32
      %220 = arith.cmpi sge, %219, %185 : i32
      %221 = arith.cmpi slt, %219, %189 : i32
      %222 = arith.andi %220, %221 : i1
      %c0_71 = arith.constant 0 : index
      %223 = arith.index_cast %219 : i32 to index
      %c0_72 = arith.constant 0 : index
      %c0_73 = arith.constant 0 : index
      %224 = vector.load %arg6[%c0_71, %223, %c0_72, %c0_73] : memref<1x16x16x32xbf16, #tpu.memory_space<vmem>>, vector<1x1x16x32xbf16>
      %225 = vector.shape_cast %224 : vector<1x1x16x32xbf16> to vector<16x32xbf16>
      %226 = arith.maximumf %218, %225 : vector<16x32xbf16>
      %227 = arith.select %222, %226, %218 : vector<16x32xbf16>
      %c4_i32_74 = arith.constant 4 : i32
      %228 = arith.addi %190, %c4_i32_74 : i32
      %229 = arith.cmpi sge, %228, %185 : i32
      %230 = arith.cmpi slt, %228, %189 : i32
      %231 = arith.andi %229, %230 : i1
      %c0_75 = arith.constant 0 : index
      %232 = arith.index_cast %228 : i32 to index
      %c0_76 = arith.constant 0 : index
      %c0_77 = arith.constant 0 : index
      %233 = vector.load %arg6[%c0_75, %232, %c0_76, %c0_77] : memref<1x16x16x32xbf16, #tpu.memory_space<vmem>>, vector<1x1x16x32xbf16>
      %234 = vector.shape_cast %233 : vector<1x1x16x32xbf16> to vector<16x32xbf16>
      %235 = arith.maximumf %227, %234 : vector<16x32xbf16>
      %236 = arith.select %231, %235, %227 : vector<16x32xbf16>
      %c5_i32_78 = arith.constant 5 : i32
      %237 = arith.addi %190, %c5_i32_78 : i32
      %238 = arith.cmpi sge, %237, %185 : i32
      %239 = arith.cmpi slt, %237, %189 : i32
      %240 = arith.andi %238, %239 : i1
      %c0_79 = arith.constant 0 : index
      %241 = arith.index_cast %237 : i32 to index
      %c0_80 = arith.constant 0 : index
      %c0_81 = arith.constant 0 : index
      %242 = vector.load %arg6[%c0_79, %241, %c0_80, %c0_81] : memref<1x16x16x32xbf16, #tpu.memory_space<vmem>>, vector<1x1x16x32xbf16>
      %243 = vector.shape_cast %242 : vector<1x1x16x32xbf16> to vector<16x32xbf16>
      %244 = arith.maximumf %236, %243 : vector<16x32xbf16>
      %245 = arith.select %240, %244, %236 : vector<16x32xbf16>
      %c6_i32_82 = arith.constant 6 : i32
      %246 = arith.addi %190, %c6_i32_82 : i32
      %247 = arith.cmpi sge, %246, %185 : i32
      %248 = arith.cmpi slt, %246, %189 : i32
      %249 = arith.andi %247, %248 : i1
      %c0_83 = arith.constant 0 : index
      %250 = arith.index_cast %246 : i32 to index
      %c0_84 = arith.constant 0 : index
      %c0_85 = arith.constant 0 : index
      %251 = vector.load %arg6[%c0_83, %250, %c0_84, %c0_85] : memref<1x16x16x32xbf16, #tpu.memory_space<vmem>>, vector<1x1x16x32xbf16>
      %252 = vector.shape_cast %251 : vector<1x1x16x32xbf16> to vector<16x32xbf16>
      %253 = arith.maximumf %245, %252 : vector<16x32xbf16>
      %254 = arith.select %249, %253, %245 : vector<16x32xbf16>
      %c4_i32_86 = arith.constant 4 : i32
      %255 = arith.muli %3, %c4_i32_86 : i32
      %c0_i32_87 = arith.constant 0 : i32
      %256 = arith.addi %255, %c0_i32_87 : i32
      %257 = arith.index_cast %256 : i32 to index
      %258 = memref.load %arg4[%257] : memref<64xi32, #tpu.memory_space<smem>>
      %c4_i32_88 = arith.constant 4 : i32
      %259 = arith.muli %3, %c4_i32_88 : i32
      %c0_i32_89 = arith.constant 0 : i32
      %260 = arith.addi %259, %c0_i32_89 : i32
      %261 = arith.index_cast %260 : i32 to index
      %262 = memref.load %arg5[%261] : memref<64xi32, #tpu.memory_space<smem>>
      %263 = vector.broadcast %258 : i32 to vector<16x1xi32>
      %264 = arith.cmpi sge, %0, %263 : vector<16x1xi32>
      %265 = vector.broadcast %262 : i32 to vector<16x1xi32>
      %266 = arith.cmpi slt, %0, %265 : vector<16x1xi32>
      %267 = arith.andi %264, %266 : vector<16x1xi1>
      %268 = vector.shape_cast %267 : vector<16x1xi1> to vector<16x1xi1>
      %269 = vector.broadcast %268 : vector<16x1xi1> to vector<16x32xi1>
      %270 = vector.broadcast %cst : bf16 to vector<16x32xbf16>
      %271 = arith.select %269, %254, %270 : vector<16x32xi1>, vector<16x32xbf16>
      %cst_90 = arith.constant dense<0xFF80> : vector<32xbf16>
      %272 = vector.multi_reduction <maximumf>, %271, %cst_90 [0] : vector<16x32xbf16> to vector<32xbf16>
      %273 = vector.shape_cast %272 : vector<32xbf16> to vector<1x32xbf16>
      %274 = arith.cmpi sle, %189, %185 : i32
      %275 = arith.cmpi sle, %262, %258 : i32
      %276 = arith.ori %274, %275 : i1
      %277 = arith.extf %273 : vector<1x32xbf16> to vector<1x32xf32>
      %cst_91 = arith.constant 0.000000e+00 : f32
      %278 = vector.broadcast %cst_91 : f32 to vector<1x32xf32>
      %279 = arith.select %276, %278, %277 : vector<1x32xf32>
      %280 = arith.addf %181, %279 : vector<1x32xf32>
      %c4_i32_92 = arith.constant 4 : i32
      %281 = arith.muli %3, %c4_i32_92 : i32
      %c1_i32_93 = arith.constant 1 : i32
      %282 = arith.addi %281, %c1_i32_93 : i32
      %283 = arith.index_cast %282 : i32 to index
      %284 = memref.load %arg4[%283] : memref<64xi32, #tpu.memory_space<smem>>
      %c4_i32_94 = arith.constant 4 : i32
      %285 = arith.muli %3, %c4_i32_94 : i32
      %c1_i32_95 = arith.constant 1 : i32
      %286 = arith.addi %285, %c1_i32_95 : i32
      %287 = arith.index_cast %286 : i32 to index
      %288 = memref.load %arg5[%287] : memref<64xi32, #tpu.memory_space<smem>>
      %289 = vector.broadcast %284 : i32 to vector<16x1xi32>
      %290 = arith.cmpi sge, %0, %289 : vector<16x1xi32>
      %291 = vector.broadcast %288 : i32 to vector<16x1xi32>
      %292 = arith.cmpi slt, %0, %291 : vector<16x1xi32>
      %293 = arith.andi %290, %292 : vector<16x1xi1>
      %294 = vector.shape_cast %293 : vector<16x1xi1> to vector<16x1xi1>
      %295 = vector.broadcast %294 : vector<16x1xi1> to vector<16x32xi1>
      %296 = vector.broadcast %cst : bf16 to vector<16x32xbf16>
      %297 = arith.select %295, %254, %296 : vector<16x32xi1>, vector<16x32xbf16>
      %cst_96 = arith.constant dense<0xFF80> : vector<32xbf16>
      %298 = vector.multi_reduction <maximumf>, %297, %cst_96 [0] : vector<16x32xbf16> to vector<32xbf16>
      %299 = vector.shape_cast %298 : vector<32xbf16> to vector<1x32xbf16>
      %300 = arith.cmpi sle, %189, %185 : i32
      %301 = arith.cmpi sle, %288, %284 : i32
      %302 = arith.ori %300, %301 : i1
      %303 = arith.extf %299 : vector<1x32xbf16> to vector<1x32xf32>
      %cst_97 = arith.constant 0.000000e+00 : f32
      %304 = vector.broadcast %cst_97 : f32 to vector<1x32xf32>
      %305 = arith.select %302, %304, %303 : vector<1x32xf32>
      %306 = arith.addf %280, %305 : vector<1x32xf32>
      %c4_i32_98 = arith.constant 4 : i32
      %307 = arith.muli %3, %c4_i32_98 : i32
      %c2_i32_99 = arith.constant 2 : i32
      %308 = arith.addi %307, %c2_i32_99 : i32
      %309 = arith.index_cast %308 : i32 to index
      %310 = memref.load %arg4[%309] : memref<64xi32, #tpu.memory_space<smem>>
      %c4_i32_100 = arith.constant 4 : i32
      %311 = arith.muli %3, %c4_i32_100 : i32
      %c2_i32_101 = arith.constant 2 : i32
      %312 = arith.addi %311, %c2_i32_101 : i32
      %313 = arith.index_cast %312 : i32 to index
      %314 = memref.load %arg5[%313] : memref<64xi32, #tpu.memory_space<smem>>
      %315 = vector.broadcast %310 : i32 to vector<16x1xi32>
      %316 = arith.cmpi sge, %0, %315 : vector<16x1xi32>
      %317 = vector.broadcast %314 : i32 to vector<16x1xi32>
      %318 = arith.cmpi slt, %0, %317 : vector<16x1xi32>
      %319 = arith.andi %316, %318 : vector<16x1xi1>
      %320 = vector.shape_cast %319 : vector<16x1xi1> to vector<16x1xi1>
      %321 = vector.broadcast %320 : vector<16x1xi1> to vector<16x32xi1>
      %322 = vector.broadcast %cst : bf16 to vector<16x32xbf16>
      %323 = arith.select %321, %254, %322 : vector<16x32xi1>, vector<16x32xbf16>
      %cst_102 = arith.constant dense<0xFF80> : vector<32xbf16>
      %324 = vector.multi_reduction <maximumf>, %323, %cst_102 [0] : vector<16x32xbf16> to vector<32xbf16>
      %325 = vector.shape_cast %324 : vector<32xbf16> to vector<1x32xbf16>
      %326 = arith.cmpi sle, %189, %185 : i32
      %327 = arith.cmpi sle, %314, %310 : i32
      %328 = arith.ori %326, %327 : i1
      %329 = arith.extf %325 : vector<1x32xbf16> to vector<1x32xf32>
      %cst_103 = arith.constant 0.000000e+00 : f32
      %330 = vector.broadcast %cst_103 : f32 to vector<1x32xf32>
      %331 = arith.select %328, %330, %329 : vector<1x32xf32>
      %332 = arith.addf %306, %331 : vector<1x32xf32>
      %c4_i32_104 = arith.constant 4 : i32
      %333 = arith.muli %3, %c4_i32_104 : i32
      %c3_i32_105 = arith.constant 3 : i32
      %334 = arith.addi %333, %c3_i32_105 : i32
      %335 = arith.index_cast %334 : i32 to index
      %336 = memref.load %arg4[%335] : memref<64xi32, #tpu.memory_space<smem>>
      %c4_i32_106 = arith.constant 4 : i32
      %337 = arith.muli %3, %c4_i32_106 : i32
      %c3_i32_107 = arith.constant 3 : i32
      %338 = arith.addi %337, %c3_i32_107 : i32
      %339 = arith.index_cast %338 : i32 to index
      %340 = memref.load %arg5[%339] : memref<64xi32, #tpu.memory_space<smem>>
      %341 = vector.broadcast %336 : i32 to vector<16x1xi32>
      %342 = arith.cmpi sge, %0, %341 : vector<16x1xi32>
      %343 = vector.broadcast %340 : i32 to vector<16x1xi32>
      %344 = arith.cmpi slt, %0, %343 : vector<16x1xi32>
      %345 = arith.andi %342, %344 : vector<16x1xi1>
      %346 = vector.shape_cast %345 : vector<16x1xi1> to vector<16x1xi1>
      %347 = vector.broadcast %346 : vector<16x1xi1> to vector<16x32xi1>
      %348 = vector.broadcast %cst : bf16 to vector<16x32xbf16>
      %349 = arith.select %347, %254, %348 : vector<16x32xi1>, vector<16x32xbf16>
      %cst_108 = arith.constant dense<0xFF80> : vector<32xbf16>
      %350 = vector.multi_reduction <maximumf>, %349, %cst_108 [0] : vector<16x32xbf16> to vector<32xbf16>
      %351 = vector.shape_cast %350 : vector<32xbf16> to vector<1x32xbf16>
      %352 = arith.cmpi sle, %189, %185 : i32
      %353 = arith.cmpi sle, %340, %336 : i32
      %354 = arith.ori %352, %353 : i1
      %355 = arith.extf %351 : vector<1x32xbf16> to vector<1x32xf32>
      %cst_109 = arith.constant 0.000000e+00 : f32
      %356 = vector.broadcast %cst_109 : f32 to vector<1x32xf32>
      %357 = arith.select %354, %356, %355 : vector<1x32xf32>
      %358 = arith.addf %332, %357 : vector<1x32xf32>
      %c4_i32_110 = arith.constant 4 : i32
      %359 = arith.muli %3, %c4_i32_110 : i32
      %c2_i32_111 = arith.constant 2 : i32
      %360 = arith.addi %359, %c2_i32_111 : i32
      %361 = arith.index_cast %360 : i32 to index
      %362 = memref.load %arg2[%361] : memref<64xi32, #tpu.memory_space<smem>>
      %c4_i32_112 = arith.constant 4 : i32
      %363 = arith.muli %3, %c4_i32_112 : i32
      %c2_i32_113 = arith.constant 2 : i32
      %364 = arith.addi %363, %c2_i32_113 : i32
      %365 = arith.index_cast %364 : i32 to index
      %366 = memref.load %arg3[%365] : memref<64xi32, #tpu.memory_space<smem>>
      %c9_i32_114 = arith.constant 9 : i32
      %367 = arith.minsi %362, %c9_i32_114 : i32
      %368 = vector.broadcast %cst : bf16 to vector<16x32xbf16>
      %c0_i32_115 = arith.constant 0 : i32
      %369 = arith.addi %367, %c0_i32_115 : i32
      %370 = arith.cmpi sge, %369, %362 : i32
      %371 = arith.cmpi slt, %369, %366 : i32
      %372 = arith.andi %370, %371 : i1
      %c0_116 = arith.constant 0 : index
      %373 = arith.index_cast %369 : i32 to index
      %c0_117 = arith.constant 0 : index
      %c0_118 = arith.constant 0 : index
      %374 = vector.load %arg6[%c0_116, %373, %c0_117, %c0_118] : memref<1x16x16x32xbf16, #tpu.memory_space<vmem>>, vector<1x1x16x32xbf16>
      %375 = vector.shape_cast %374 : vector<1x1x16x32xbf16> to vector<16x32xbf16>
      %376 = arith.maximumf %368, %375 : vector<16x32xbf16>
      %377 = arith.select %372, %376, %368 : vector<16x32xbf16>
      %c1_i32_119 = arith.constant 1 : i32
      %378 = arith.addi %367, %c1_i32_119 : i32
      %379 = arith.cmpi sge, %378, %362 : i32
      %380 = arith.cmpi slt, %378, %366 : i32
      %381 = arith.andi %379, %380 : i1
      %c0_120 = arith.constant 0 : index
      %382 = arith.index_cast %378 : i32 to index
      %c0_121 = arith.constant 0 : index
      %c0_122 = arith.constant 0 : index
      %383 = vector.load %arg6[%c0_120, %382, %c0_121, %c0_122] : memref<1x16x16x32xbf16, #tpu.memory_space<vmem>>, vector<1x1x16x32xbf16>
      %384 = vector.shape_cast %383 : vector<1x1x16x32xbf16> to vector<16x32xbf16>
      %385 = arith.maximumf %377, %384 : vector<16x32xbf16>
      %386 = arith.select %381, %385, %377 : vector<16x32xbf16>
      %c2_i32_123 = arith.constant 2 : i32
      %387 = arith.addi %367, %c2_i32_123 : i32
      %388 = arith.cmpi sge, %387, %362 : i32
      %389 = arith.cmpi slt, %387, %366 : i32
      %390 = arith.andi %388, %389 : i1
      %c0_124 = arith.constant 0 : index
      %391 = arith.index_cast %387 : i32 to index
      %c0_125 = arith.constant 0 : index
      %c0_126 = arith.constant 0 : index
      %392 = vector.load %arg6[%c0_124, %391, %c0_125, %c0_126] : memref<1x16x16x32xbf16, #tpu.memory_space<vmem>>, vector<1x1x16x32xbf16>
      %393 = vector.shape_cast %392 : vector<1x1x16x32xbf16> to vector<16x32xbf16>
      %394 = arith.maximumf %386, %393 : vector<16x32xbf16>
      %395 = arith.select %390, %394, %386 : vector<16x32xbf16>
      %c3_i32_127 = arith.constant 3 : i32
      %396 = arith.addi %367, %c3_i32_127 : i32
      %397 = arith.cmpi sge, %396, %362 : i32
      %398 = arith.cmpi slt, %396, %366 : i32
      %399 = arith.andi %397, %398 : i1
      %c0_128 = arith.constant 0 : index
      %400 = arith.index_cast %396 : i32 to index
      %c0_129 = arith.constant 0 : index
      %c0_130 = arith.constant 0 : index
      %401 = vector.load %arg6[%c0_128, %400, %c0_129, %c0_130] : memref<1x16x16x32xbf16, #tpu.memory_space<vmem>>, vector<1x1x16x32xbf16>
      %402 = vector.shape_cast %401 : vector<1x1x16x32xbf16> to vector<16x32xbf16>
      %403 = arith.maximumf %395, %402 : vector<16x32xbf16>
      %404 = arith.select %399, %403, %395 : vector<16x32xbf16>
      %c4_i32_131 = arith.constant 4 : i32
      %405 = arith.addi %367, %c4_i32_131 : i32
      %406 = arith.cmpi sge, %405, %362 : i32
      %407 = arith.cmpi slt, %405, %366 : i32
      %408 = arith.andi %406, %407 : i1
      %c0_132 = arith.constant 0 : index
      %409 = arith.index_cast %405 : i32 to index
      %c0_133 = arith.constant 0 : index
      %c0_134 = arith.constant 0 : index
      %410 = vector.load %arg6[%c0_132, %409, %c0_133, %c0_134] : memref<1x16x16x32xbf16, #tpu.memory_space<vmem>>, vector<1x1x16x32xbf16>
      %411 = vector.shape_cast %410 : vector<1x1x16x32xbf16> to vector<16x32xbf16>
      %412 = arith.maximumf %404, %411 : vector<16x32xbf16>
      %413 = arith.select %408, %412, %404 : vector<16x32xbf16>
      %c5_i32_135 = arith.constant 5 : i32
      %414 = arith.addi %367, %c5_i32_135 : i32
      %415 = arith.cmpi sge, %414, %362 : i32
      %416 = arith.cmpi slt, %414, %366 : i32
      %417 = arith.andi %415, %416 : i1
      %c0_136 = arith.constant 0 : index
      %418 = arith.index_cast %414 : i32 to index
      %c0_137 = arith.constant 0 : index
      %c0_138 = arith.constant 0 : index
      %419 = vector.load %arg6[%c0_136, %418, %c0_137, %c0_138] : memref<1x16x16x32xbf16, #tpu.memory_space<vmem>>, vector<1x1x16x32xbf16>
      %420 = vector.shape_cast %419 : vector<1x1x16x32xbf16> to vector<16x32xbf16>
      %421 = arith.maximumf %413, %420 : vector<16x32xbf16>
      %422 = arith.select %417, %421, %413 : vector<16x32xbf16>
      %c6_i32_139 = arith.constant 6 : i32
      %423 = arith.addi %367, %c6_i32_139 : i32
      %424 = arith.cmpi sge, %423, %362 : i32
      %425 = arith.cmpi slt, %423, %366 : i32
      %426 = arith.andi %424, %425 : i1
      %c0_140 = arith.constant 0 : index
      %427 = arith.index_cast %423 : i32 to index
      %c0_141 = arith.constant 0 : index
      %c0_142 = arith.constant 0 : index
      %428 = vector.load %arg6[%c0_140, %427, %c0_141, %c0_142] : memref<1x16x16x32xbf16, #tpu.memory_space<vmem>>, vector<1x1x16x32xbf16>
      %429 = vector.shape_cast %428 : vector<1x1x16x32xbf16> to vector<16x32xbf16>
      %430 = arith.maximumf %422, %429 : vector<16x32xbf16>
      %431 = arith.select %426, %430, %422 : vector<16x32xbf16>
      %c4_i32_143 = arith.constant 4 : i32
      %432 = arith.muli %3, %c4_i32_143 : i32
      %c0_i32_144 = arith.constant 0 : i32
      %433 = arith.addi %432, %c0_i32_144 : i32
      %434 = arith.index_cast %433 : i32 to index
      %435 = memref.load %arg4[%434] : memref<64xi32, #tpu.memory_space<smem>>
      %c4_i32_145 = arith.constant 4 : i32
      %436 = arith.muli %3, %c4_i32_145 : i32
      %c0_i32_146 = arith.constant 0 : i32
      %437 = arith.addi %436, %c0_i32_146 : i32
      %438 = arith.index_cast %437 : i32 to index
      %439 = memref.load %arg5[%438] : memref<64xi32, #tpu.memory_space<smem>>
      %440 = vector.broadcast %435 : i32 to vector<16x1xi32>
      %441 = arith.cmpi sge, %0, %440 : vector<16x1xi32>
      %442 = vector.broadcast %439 : i32 to vector<16x1xi32>
      %443 = arith.cmpi slt, %0, %442 : vector<16x1xi32>
      %444 = arith.andi %441, %443 : vector<16x1xi1>
      %445 = vector.shape_cast %444 : vector<16x1xi1> to vector<16x1xi1>
      %446 = vector.broadcast %445 : vector<16x1xi1> to vector<16x32xi1>
      %447 = vector.broadcast %cst : bf16 to vector<16x32xbf16>
      %448 = arith.select %446, %431, %447 : vector<16x32xi1>, vector<16x32xbf16>
      %cst_147 = arith.constant dense<0xFF80> : vector<32xbf16>
      %449 = vector.multi_reduction <maximumf>, %448, %cst_147 [0] : vector<16x32xbf16> to vector<32xbf16>
      %450 = vector.shape_cast %449 : vector<32xbf16> to vector<1x32xbf16>
      %451 = arith.cmpi sle, %366, %362 : i32
      %452 = arith.cmpi sle, %439, %435 : i32
      %453 = arith.ori %451, %452 : i1
      %454 = arith.extf %450 : vector<1x32xbf16> to vector<1x32xf32>
      %cst_148 = arith.constant 0.000000e+00 : f32
      %455 = vector.broadcast %cst_148 : f32 to vector<1x32xf32>
      %456 = arith.select %453, %455, %454 : vector<1x32xf32>
      %457 = arith.addf %358, %456 : vector<1x32xf32>
      %c4_i32_149 = arith.constant 4 : i32
      %458 = arith.muli %3, %c4_i32_149 : i32
      %c1_i32_150 = arith.constant 1 : i32
      %459 = arith.addi %458, %c1_i32_150 : i32
      %460 = arith.index_cast %459 : i32 to index
      %461 = memref.load %arg4[%460] : memref<64xi32, #tpu.memory_space<smem>>
      %c4_i32_151 = arith.constant 4 : i32
      %462 = arith.muli %3, %c4_i32_151 : i32
      %c1_i32_152 = arith.constant 1 : i32
      %463 = arith.addi %462, %c1_i32_152 : i32
      %464 = arith.index_cast %463 : i32 to index
      %465 = memref.load %arg5[%464] : memref<64xi32, #tpu.memory_space<smem>>
      %466 = vector.broadcast %461 : i32 to vector<16x1xi32>
      %467 = arith.cmpi sge, %0, %466 : vector<16x1xi32>
      %468 = vector.broadcast %465 : i32 to vector<16x1xi32>
      %469 = arith.cmpi slt, %0, %468 : vector<16x1xi32>
      %470 = arith.andi %467, %469 : vector<16x1xi1>
      %471 = vector.shape_cast %470 : vector<16x1xi1> to vector<16x1xi1>
      %472 = vector.broadcast %471 : vector<16x1xi1> to vector<16x32xi1>
      %473 = vector.broadcast %cst : bf16 to vector<16x32xbf16>
      %474 = arith.select %472, %431, %473 : vector<16x32xi1>, vector<16x32xbf16>
      %cst_153 = arith.constant dense<0xFF80> : vector<32xbf16>
      %475 = vector.multi_reduction <maximumf>, %474, %cst_153 [0] : vector<16x32xbf16> to vector<32xbf16>
      %476 = vector.shape_cast %475 : vector<32xbf16> to vector<1x32xbf16>
      %477 = arith.cmpi sle, %366, %362 : i32
      %478 = arith.cmpi sle, %465, %461 : i32
      %479 = arith.ori %477, %478 : i1
      %480 = arith.extf %476 : vector<1x32xbf16> to vector<1x32xf32>
      %cst_154 = arith.constant 0.000000e+00 : f32
      %481 = vector.broadcast %cst_154 : f32 to vector<1x32xf32>
      %482 = arith.select %479, %481, %480 : vector<1x32xf32>
      %483 = arith.addf %457, %482 : vector<1x32xf32>
      %c4_i32_155 = arith.constant 4 : i32
      %484 = arith.muli %3, %c4_i32_155 : i32
      %c2_i32_156 = arith.constant 2 : i32
      %485 = arith.addi %484, %c2_i32_156 : i32
      %486 = arith.index_cast %485 : i32 to index
      %487 = memref.load %arg4[%486] : memref<64xi32, #tpu.memory_space<smem>>
      %c4_i32_157 = arith.constant 4 : i32
      %488 = arith.muli %3, %c4_i32_157 : i32
      %c2_i32_158 = arith.constant 2 : i32
      %489 = arith.addi %488, %c2_i32_158 : i32
      %490 = arith.index_cast %489 : i32 to index
      %491 = memref.load %arg5[%490] : memref<64xi32, #tpu.memory_space<smem>>
      %492 = vector.broadcast %487 : i32 to vector<16x1xi32>
      %493 = arith.cmpi sge, %0, %492 : vector<16x1xi32>
      %494 = vector.broadcast %491 : i32 to vector<16x1xi32>
      %495 = arith.cmpi slt, %0, %494 : vector<16x1xi32>
      %496 = arith.andi %493, %495 : vector<16x1xi1>
      %497 = vector.shape_cast %496 : vector<16x1xi1> to vector<16x1xi1>
      %498 = vector.broadcast %497 : vector<16x1xi1> to vector<16x32xi1>
      %499 = vector.broadcast %cst : bf16 to vector<16x32xbf16>
      %500 = arith.select %498, %431, %499 : vector<16x32xi1>, vector<16x32xbf16>
      %cst_159 = arith.constant dense<0xFF80> : vector<32xbf16>
      %501 = vector.multi_reduction <maximumf>, %500, %cst_159 [0] : vector<16x32xbf16> to vector<32xbf16>
      %502 = vector.shape_cast %501 : vector<32xbf16> to vector<1x32xbf16>
      %503 = arith.cmpi sle, %366, %362 : i32
      %504 = arith.cmpi sle, %491, %487 : i32
      %505 = arith.ori %503, %504 : i1
      %506 = arith.extf %502 : vector<1x32xbf16> to vector<1x32xf32>
      %cst_160 = arith.constant 0.000000e+00 : f32
      %507 = vector.broadcast %cst_160 : f32 to vector<1x32xf32>
      %508 = arith.select %505, %507, %506 : vector<1x32xf32>
      %509 = arith.addf %483, %508 : vector<1x32xf32>
      %c4_i32_161 = arith.constant 4 : i32
      %510 = arith.muli %3, %c4_i32_161 : i32
      %c3_i32_162 = arith.constant 3 : i32
      %511 = arith.addi %510, %c3_i32_162 : i32
      %512 = arith.index_cast %511 : i32 to index
      %513 = memref.load %arg4[%512] : memref<64xi32, #tpu.memory_space<smem>>
      %c4_i32_163 = arith.constant 4 : i32
      %514 = arith.muli %3, %c4_i32_163 : i32
      %c3_i32_164 = arith.constant 3 : i32
      %515 = arith.addi %514, %c3_i32_164 : i32
      %516 = arith.index_cast %515 : i32 to index
      %517 = memref.load %arg5[%516] : memref<64xi32, #tpu.memory_space<smem>>
      %518 = vector.broadcast %513 : i32 to vector<16x1xi32>
      %519 = arith.cmpi sge, %0, %518 : vector<16x1xi32>
      %520 = vector.broadcast %517 : i32 to vector<16x1xi32>
      %521 = arith.cmpi slt, %0, %520 : vector<16x1xi32>
      %522 = arith.andi %519, %521 : vector<16x1xi1>
      %523 = vector.shape_cast %522 : vector<16x1xi1> to vector<16x1xi1>
      %524 = vector.broadcast %523 : vector<16x1xi1> to vector<16x32xi1>
      %525 = vector.broadcast %cst : bf16 to vector<16x32xbf16>
      %526 = arith.select %524, %431, %525 : vector<16x32xi1>, vector<16x32xbf16>
      %cst_165 = arith.constant dense<0xFF80> : vector<32xbf16>
      %527 = vector.multi_reduction <maximumf>, %526, %cst_165 [0] : vector<16x32xbf16> to vector<32xbf16>
      %528 = vector.shape_cast %527 : vector<32xbf16> to vector<1x32xbf16>
      %529 = arith.cmpi sle, %366, %362 : i32
      %530 = arith.cmpi sle, %517, %513 : i32
      %531 = arith.ori %529, %530 : i1
      %532 = arith.extf %528 : vector<1x32xbf16> to vector<1x32xf32>
      %cst_166 = arith.constant 0.000000e+00 : f32
      %533 = vector.broadcast %cst_166 : f32 to vector<1x32xf32>
      %534 = arith.select %531, %533, %532 : vector<1x32xf32>
      %535 = arith.addf %509, %534 : vector<1x32xf32>
      %c4_i32_167 = arith.constant 4 : i32
      %536 = arith.muli %3, %c4_i32_167 : i32
      %c3_i32_168 = arith.constant 3 : i32
      %537 = arith.addi %536, %c3_i32_168 : i32
      %538 = arith.index_cast %537 : i32 to index
      %539 = memref.load %arg2[%538] : memref<64xi32, #tpu.memory_space<smem>>
      %c4_i32_169 = arith.constant 4 : i32
      %540 = arith.muli %3, %c4_i32_169 : i32
      %c3_i32_170 = arith.constant 3 : i32
      %541 = arith.addi %540, %c3_i32_170 : i32
      %542 = arith.index_cast %541 : i32 to index
      %543 = memref.load %arg3[%542] : memref<64xi32, #tpu.memory_space<smem>>
      %c9_i32_171 = arith.constant 9 : i32
      %544 = arith.minsi %539, %c9_i32_171 : i32
      %545 = vector.broadcast %cst : bf16 to vector<16x32xbf16>
      %c0_i32_172 = arith.constant 0 : i32
      %546 = arith.addi %544, %c0_i32_172 : i32
      %547 = arith.cmpi sge, %546, %539 : i32
      %548 = arith.cmpi slt, %546, %543 : i32
      %549 = arith.andi %547, %548 : i1
      %c0_173 = arith.constant 0 : index
      %550 = arith.index_cast %546 : i32 to index
      %c0_174 = arith.constant 0 : index
      %c0_175 = arith.constant 0 : index
      %551 = vector.load %arg6[%c0_173, %550, %c0_174, %c0_175] : memref<1x16x16x32xbf16, #tpu.memory_space<vmem>>, vector<1x1x16x32xbf16>
      %552 = vector.shape_cast %551 : vector<1x1x16x32xbf16> to vector<16x32xbf16>
      %553 = arith.maximumf %545, %552 : vector<16x32xbf16>
      %554 = arith.select %549, %553, %545 : vector<16x32xbf16>
      %c1_i32_176 = arith.constant 1 : i32
      %555 = arith.addi %544, %c1_i32_176 : i32
      %556 = arith.cmpi sge, %555, %539 : i32
      %557 = arith.cmpi slt, %555, %543 : i32
      %558 = arith.andi %556, %557 : i1
      %c0_177 = arith.constant 0 : index
      %559 = arith.index_cast %555 : i32 to index
      %c0_178 = arith.constant 0 : index
      %c0_179 = arith.constant 0 : index
      %560 = vector.load %arg6[%c0_177, %559, %c0_178, %c0_179] : memref<1x16x16x32xbf16, #tpu.memory_space<vmem>>, vector<1x1x16x32xbf16>
      %561 = vector.shape_cast %560 : vector<1x1x16x32xbf16> to vector<16x32xbf16>
      %562 = arith.maximumf %554, %561 : vector<16x32xbf16>
      %563 = arith.select %558, %562, %554 : vector<16x32xbf16>
      %c2_i32_180 = arith.constant 2 : i32
      %564 = arith.addi %544, %c2_i32_180 : i32
      %565 = arith.cmpi sge, %564, %539 : i32
      %566 = arith.cmpi slt, %564, %543 : i32
      %567 = arith.andi %565, %566 : i1
      %c0_181 = arith.constant 0 : index
      %568 = arith.index_cast %564 : i32 to index
      %c0_182 = arith.constant 0 : index
      %c0_183 = arith.constant 0 : index
      %569 = vector.load %arg6[%c0_181, %568, %c0_182, %c0_183] : memref<1x16x16x32xbf16, #tpu.memory_space<vmem>>, vector<1x1x16x32xbf16>
      %570 = vector.shape_cast %569 : vector<1x1x16x32xbf16> to vector<16x32xbf16>
      %571 = arith.maximumf %563, %570 : vector<16x32xbf16>
      %572 = arith.select %567, %571, %563 : vector<16x32xbf16>
      %c3_i32_184 = arith.constant 3 : i32
      %573 = arith.addi %544, %c3_i32_184 : i32
      %574 = arith.cmpi sge, %573, %539 : i32
      %575 = arith.cmpi slt, %573, %543 : i32
      %576 = arith.andi %574, %575 : i1
      %c0_185 = arith.constant 0 : index
      %577 = arith.index_cast %573 : i32 to index
      %c0_186 = arith.constant 0 : index
      %c0_187 = arith.constant 0 : index
      %578 = vector.load %arg6[%c0_185, %577, %c0_186, %c0_187] : memref<1x16x16x32xbf16, #tpu.memory_space<vmem>>, vector<1x1x16x32xbf16>
      %579 = vector.shape_cast %578 : vector<1x1x16x32xbf16> to vector<16x32xbf16>
      %580 = arith.maximumf %572, %579 : vector<16x32xbf16>
      %581 = arith.select %576, %580, %572 : vector<16x32xbf16>
      %c4_i32_188 = arith.constant 4 : i32
      %582 = arith.addi %544, %c4_i32_188 : i32
      %583 = arith.cmpi sge, %582, %539 : i32
      %584 = arith.cmpi slt, %582, %543 : i32
      %585 = arith.andi %583, %584 : i1
      %c0_189 = arith.constant 0 : index
      %586 = arith.index_cast %582 : i32 to index
      %c0_190 = arith.constant 0 : index
      %c0_191 = arith.constant 0 : index
      %587 = vector.load %arg6[%c0_189, %586, %c0_190, %c0_191] : memref<1x16x16x32xbf16, #tpu.memory_space<vmem>>, vector<1x1x16x32xbf16>
      %588 = vector.shape_cast %587 : vector<1x1x16x32xbf16> to vector<16x32xbf16>
      %589 = arith.maximumf %581, %588 : vector<16x32xbf16>
      %590 = arith.select %585, %589, %581 : vector<16x32xbf16>
      %c5_i32_192 = arith.constant 5 : i32
      %591 = arith.addi %544, %c5_i32_192 : i32
      %592 = arith.cmpi sge, %591, %539 : i32
      %593 = arith.cmpi slt, %591, %543 : i32
      %594 = arith.andi %592, %593 : i1
      %c0_193 = arith.constant 0 : index
      %595 = arith.index_cast %591 : i32 to index
      %c0_194 = arith.constant 0 : index
      %c0_195 = arith.constant 0 : index
      %596 = vector.load %arg6[%c0_193, %595, %c0_194, %c0_195] : memref<1x16x16x32xbf16, #tpu.memory_space<vmem>>, vector<1x1x16x32xbf16>
      %597 = vector.shape_cast %596 : vector<1x1x16x32xbf16> to vector<16x32xbf16>
      %598 = arith.maximumf %590, %597 : vector<16x32xbf16>
      %599 = arith.select %594, %598, %590 : vector<16x32xbf16>
      %c6_i32_196 = arith.constant 6 : i32
      %600 = arith.addi %544, %c6_i32_196 : i32
      %601 = arith.cmpi sge, %600, %539 : i32
      %602 = arith.cmpi slt, %600, %543 : i32
      %603 = arith.andi %601, %602 : i1
      %c0_197 = arith.constant 0 : index
      %604 = arith.index_cast %600 : i32 to index
      %c0_198 = arith.constant 0 : index
      %c0_199 = arith.constant 0 : index
      %605 = vector.load %arg6[%c0_197, %604, %c0_198, %c0_199] : memref<1x16x16x32xbf16, #tpu.memory_space<vmem>>, vector<1x1x16x32xbf16>
      %606 = vector.shape_cast %605 : vector<1x1x16x32xbf16> to vector<16x32xbf16>
      %607 = arith.maximumf %599, %606 : vector<16x32xbf16>
      %608 = arith.select %603, %607, %599 : vector<16x32xbf16>
      %c4_i32_200 = arith.constant 4 : i32
      %609 = arith.muli %3, %c4_i32_200 : i32
      %c0_i32_201 = arith.constant 0 : i32
      %610 = arith.addi %609, %c0_i32_201 : i32
      %611 = arith.index_cast %610 : i32 to index
      %612 = memref.load %arg4[%611] : memref<64xi32, #tpu.memory_space<smem>>
      %c4_i32_202 = arith.constant 4 : i32
      %613 = arith.muli %3, %c4_i32_202 : i32
      %c0_i32_203 = arith.constant 0 : i32
      %614 = arith.addi %613, %c0_i32_203 : i32
      %615 = arith.index_cast %614 : i32 to index
      %616 = memref.load %arg5[%615] : memref<64xi32, #tpu.memory_space<smem>>
      %617 = vector.broadcast %612 : i32 to vector<16x1xi32>
      %618 = arith.cmpi sge, %0, %617 : vector<16x1xi32>
      %619 = vector.broadcast %616 : i32 to vector<16x1xi32>
      %620 = arith.cmpi slt, %0, %619 : vector<16x1xi32>
      %621 = arith.andi %618, %620 : vector<16x1xi1>
      %622 = vector.shape_cast %621 : vector<16x1xi1> to vector<16x1xi1>
      %623 = vector.broadcast %622 : vector<16x1xi1> to vector<16x32xi1>
      %624 = vector.broadcast %cst : bf16 to vector<16x32xbf16>
      %625 = arith.select %623, %608, %624 : vector<16x32xi1>, vector<16x32xbf16>
      %cst_204 = arith.constant dense<0xFF80> : vector<32xbf16>
      %626 = vector.multi_reduction <maximumf>, %625, %cst_204 [0] : vector<16x32xbf16> to vector<32xbf16>
      %627 = vector.shape_cast %626 : vector<32xbf16> to vector<1x32xbf16>
      %628 = arith.cmpi sle, %543, %539 : i32
      %629 = arith.cmpi sle, %616, %612 : i32
      %630 = arith.ori %628, %629 : i1
      %631 = arith.extf %627 : vector<1x32xbf16> to vector<1x32xf32>
      %cst_205 = arith.constant 0.000000e+00 : f32
      %632 = vector.broadcast %cst_205 : f32 to vector<1x32xf32>
      %633 = arith.select %630, %632, %631 : vector<1x32xf32>
      %634 = arith.addf %535, %633 : vector<1x32xf32>
      %c4_i32_206 = arith.constant 4 : i32
      %635 = arith.muli %3, %c4_i32_206 : i32
      %c1_i32_207 = arith.constant 1 : i32
      %636 = arith.addi %635, %c1_i32_207 : i32
      %637 = arith.index_cast %636 : i32 to index
      %638 = memref.load %arg4[%637] : memref<64xi32, #tpu.memory_space<smem>>
      %c4_i32_208 = arith.constant 4 : i32
      %639 = arith.muli %3, %c4_i32_208 : i32
      %c1_i32_209 = arith.constant 1 : i32
      %640 = arith.addi %639, %c1_i32_209 : i32
      %641 = arith.index_cast %640 : i32 to index
      %642 = memref.load %arg5[%641] : memref<64xi32, #tpu.memory_space<smem>>
      %643 = vector.broadcast %638 : i32 to vector<16x1xi32>
      %644 = arith.cmpi sge, %0, %643 : vector<16x1xi32>
      %645 = vector.broadcast %642 : i32 to vector<16x1xi32>
      %646 = arith.cmpi slt, %0, %645 : vector<16x1xi32>
      %647 = arith.andi %644, %646 : vector<16x1xi1>
      %648 = vector.shape_cast %647 : vector<16x1xi1> to vector<16x1xi1>
      %649 = vector.broadcast %648 : vector<16x1xi1> to vector<16x32xi1>
      %650 = vector.broadcast %cst : bf16 to vector<16x32xbf16>
      %651 = arith.select %649, %608, %650 : vector<16x32xi1>, vector<16x32xbf16>
      %cst_210 = arith.constant dense<0xFF80> : vector<32xbf16>
      %652 = vector.multi_reduction <maximumf>, %651, %cst_210 [0] : vector<16x32xbf16> to vector<32xbf16>
      %653 = vector.shape_cast %652 : vector<32xbf16> to vector<1x32xbf16>
      %654 = arith.cmpi sle, %543, %539 : i32
      %655 = arith.cmpi sle, %642, %638 : i32
      %656 = arith.ori %654, %655 : i1
      %657 = arith.extf %653 : vector<1x32xbf16> to vector<1x32xf32>
      %cst_211 = arith.constant 0.000000e+00 : f32
      %658 = vector.broadcast %cst_211 : f32 to vector<1x32xf32>
      %659 = arith.select %656, %658, %657 : vector<1x32xf32>
      %660 = arith.addf %634, %659 : vector<1x32xf32>
      %c4_i32_212 = arith.constant 4 : i32
      %661 = arith.muli %3, %c4_i32_212 : i32
      %c2_i32_213 = arith.constant 2 : i32
      %662 = arith.addi %661, %c2_i32_213 : i32
      %663 = arith.index_cast %662 : i32 to index
      %664 = memref.load %arg4[%663] : memref<64xi32, #tpu.memory_space<smem>>
      %c4_i32_214 = arith.constant 4 : i32
      %665 = arith.muli %3, %c4_i32_214 : i32
      %c2_i32_215 = arith.constant 2 : i32
      %666 = arith.addi %665, %c2_i32_215 : i32
      %667 = arith.index_cast %666 : i32 to index
      %668 = memref.load %arg5[%667] : memref<64xi32, #tpu.memory_space<smem>>
      %669 = vector.broadcast %664 : i32 to vector<16x1xi32>
      %670 = arith.cmpi sge, %0, %669 : vector<16x1xi32>
      %671 = vector.broadcast %668 : i32 to vector<16x1xi32>
      %672 = arith.cmpi slt, %0, %671 : vector<16x1xi32>
      %673 = arith.andi %670, %672 : vector<16x1xi1>
      %674 = vector.shape_cast %673 : vector<16x1xi1> to vector<16x1xi1>
      %675 = vector.broadcast %674 : vector<16x1xi1> to vector<16x32xi1>
      %676 = vector.broadcast %cst : bf16 to vector<16x32xbf16>
      %677 = arith.select %675, %608, %676 : vector<16x32xi1>, vector<16x32xbf16>
      %cst_216 = arith.constant dense<0xFF80> : vector<32xbf16>
      %678 = vector.multi_reduction <maximumf>, %677, %cst_216 [0] : vector<16x32xbf16> to vector<32xbf16>
      %679 = vector.shape_cast %678 : vector<32xbf16> to vector<1x32xbf16>
      %680 = arith.cmpi sle, %543, %539 : i32
      %681 = arith.cmpi sle, %668, %664 : i32
      %682 = arith.ori %680, %681 : i1
      %683 = arith.extf %679 : vector<1x32xbf16> to vector<1x32xf32>
      %cst_217 = arith.constant 0.000000e+00 : f32
      %684 = vector.broadcast %cst_217 : f32 to vector<1x32xf32>
      %685 = arith.select %682, %684, %683 : vector<1x32xf32>
      %686 = arith.addf %660, %685 : vector<1x32xf32>
      %c4_i32_218 = arith.constant 4 : i32
      %687 = arith.muli %3, %c4_i32_218 : i32
      %c3_i32_219 = arith.constant 3 : i32
      %688 = arith.addi %687, %c3_i32_219 : i32
      %689 = arith.index_cast %688 : i32 to index
      %690 = memref.load %arg4[%689] : memref<64xi32, #tpu.memory_space<smem>>
      %c4_i32_220 = arith.constant 4 : i32
      %691 = arith.muli %3, %c4_i32_220 : i32
      %c3_i32_221 = arith.constant 3 : i32
      %692 = arith.addi %691, %c3_i32_221 : i32
      %693 = arith.index_cast %692 : i32 to index
      %694 = memref.load %arg5[%693] : memref<64xi32, #tpu.memory_space<smem>>
      %695 = vector.broadcast %690 : i32 to vector<16x1xi32>
      %696 = arith.cmpi sge, %0, %695 : vector<16x1xi32>
      %697 = vector.broadcast %694 : i32 to vector<16x1xi32>
      %698 = arith.cmpi slt, %0, %697 : vector<16x1xi32>
      %699 = arith.andi %696, %698 : vector<16x1xi1>
      %700 = vector.shape_cast %699 : vector<16x1xi1> to vector<16x1xi1>
      %701 = vector.broadcast %700 : vector<16x1xi1> to vector<16x32xi1>
      %702 = vector.broadcast %cst : bf16 to vector<16x32xbf16>
      %703 = arith.select %701, %608, %702 : vector<16x32xi1>, vector<16x32xbf16>
      %cst_222 = arith.constant dense<0xFF80> : vector<32xbf16>
      %704 = vector.multi_reduction <maximumf>, %703, %cst_222 [0] : vector<16x32xbf16> to vector<32xbf16>
      %705 = vector.shape_cast %704 : vector<32xbf16> to vector<1x32xbf16>
      %706 = arith.cmpi sle, %543, %539 : i32
      %707 = arith.cmpi sle, %694, %690 : i32
      %708 = arith.ori %706, %707 : i1
      %709 = arith.extf %705 : vector<1x32xbf16> to vector<1x32xf32>
      %cst_223 = arith.constant 0.000000e+00 : f32
      %710 = vector.broadcast %cst_223 : f32 to vector<1x32xf32>
      %711 = arith.select %708, %710, %709 : vector<1x32xf32>
      %712 = arith.addf %686, %711 : vector<1x32xf32>
      %cst_224 = arith.constant 6.250000e-02 : f32
      %713 = vector.broadcast %cst_224 : f32 to vector<1x32xf32>
      %714 = arith.mulf %712, %713 : vector<1x32xf32>
      %715 = arith.index_cast %arg8 : i32 to index
      %c0_225 = arith.constant 0 : index
      %c0_226 = arith.constant 0 : index
      %716 = vector.load %arg7[%715, %c0_225, %c0_226] : memref<8x1x32xf32, #tpu.memory_space<vmem>>, vector<1x1x32xf32>
      %717 = vector.shape_cast %716 : vector<1x1x32xf32> to vector<1x32xf32>
      %718 = vector.shape_cast %714 : vector<1x32xf32> to vector<1x1x32xf32>
      tpu.vector_store %arg7[%715, %c0_225, %c0_226], %718 {strides = array<i32>} : memref<8x1x32xf32, #tpu.memory_space<vmem>>, vector<1x1x32xf32>,
    }
    %c8_i32_0 = arith.constant 8 : i32
    return
  }
  func.func @transform_0(%arg0: i32, %arg1: memref<16xi32, #tpu.memory_space<smem>>, %arg2: memref<64xi32, #tpu.memory_space<smem>>, %arg3: memref<64xi32, #tpu.memory_space<smem>>, %arg4: memref<64xi32, #tpu.memory_space<smem>>, %arg5: memref<64xi32, #tpu.memory_space<smem>>) -> (i32, i32, i32, i32) {
    %c8_i32 = arith.constant 8 : i32
    %0 = arith.muli %arg0, %c8_i32 : i32
    %1 = arith.index_cast %0 : i32 to index
    %2 = memref.load %arg1[%1] : memref<16xi32, #tpu.memory_space<smem>>
    %c0_i32 = arith.constant 0 : i32
    %c0_i32_0 = arith.constant 0 : i32
    %c0_i32_1 = arith.constant 0 : i32
    %c0_i32_2 = arith.constant 0 : i32
    return %2, %c0_i32, %c0_i32_0, %c0_i32_1 : i32, i32, i32, i32
  }
  func.func @transform_1(%arg0: i32, %arg1: memref<16xi32, #tpu.memory_space<smem>>, %arg2: memref<64xi32, #tpu.memory_space<smem>>, %arg3: memref<64xi32, #tpu.memory_space<smem>>, %arg4: memref<64xi32, #tpu.memory_space<smem>>, %arg5: memref<64xi32, #tpu.memory_space<smem>>) -> (i32, i32, i32) {
    %c0_i32 = arith.constant 0 : i32
    %c0_i32_0 = arith.constant 0 : i32
    %c0_i32_1 = arith.constant 0 : i32
    return %arg0, %c0_i32, %c0_i32_0 : i32, i32, i32
  }
}

</mosaic_0001>

<bundles_post_ra>
// kernel: tpu_custom_call.1
= control target key start
LH: loop header
LB: loop body
LE: loop exit
PB: predicated region body
PF: predicated region fallthrough
CT: control target
= control target key end

     0   :  { %s1942_s27 = smov [#allocation3]   ;;  %s1943_s28 = smov [#allocation4]   ;;  %s3674_s0 = inlined_call_operand.hbm [shape: s32[16], index: 0, kind: input, shape index: {}]   ;;  %s3675_s5 = inlined_call_operand.hbm [shape: bf16[2,16,16,32], index: 5, kind: input, shape index: {}]   ;;  %s3676_s6 = inlined_call_operand.hbm [shape: f32[16,1,32], index: 6, kind: output, shape index: {}]   ;;  %s3677_s1 = inlined_call_operand.hbm [shape: s32[64], index: 1, kind: input, shape index: {}]   ;;  %s3678_s2 = inlined_call_operand.vmem [shape: s32[64], index: 2, kind: input, shape index: {}]   ;;  %s3679_s3 = inlined_call_operand.vmem [shape: s32[64], index: 3, kind: input, shape index: {}]   ;;  %s3680_s4 = inlined_call_operand.vmem [shape: s32[64], index: 4, kind: input, shape index: {}]  }
   0x1   :  { %3702 = sst [smem:[#allocation29_spill]] %s3675_s5  ;;  %s12_s23 = sshll.u32 %s3674_s0, 4  ;;  %s13_s23 = int_to_ptr.hbm [resolvable:$true] %s12_s23 }
   0x2   :  { %3703 = sst [smem:[#allocation30_spill]] %s3676_s6  ;;  %s17_s26 = sshll.u32 %s3677_s1, 4  ;;  %s18_s26 = int_to_ptr.hbm [resolvable:$true] %s17_s26 }
   0x3   :  { %15 = dma.hbm_to_smem %s13_s23, 16, %s1942_s27, [#allocation2] }
   0x4   :  { %20 = dma.hbm_to_smem %s18_s26, 16, %s1943_s28, [#allocation2] }
   0x5   :  { %s22_s7 = sshll.u32 %s3678_s2, 4  ;;  %s27_s10 = sshll.u32 %s3679_s3, 4  ;;  %s23_s7 = int_to_ptr.vmem [resolvable:$true] %s22_s7  ;;  %s28_s10 = int_to_ptr.vmem [resolvable:$true] %s27_s10 }
   0x6   :  { %s1944_s0 = smov [#allocation5]   ;;  %s1945_s11 = smov [#allocation6]  }
   0x7   :  { %25 = dma.vmem_to_smem %s23_s7, 16, %s1944_s0, [#allocation2] }
   0x8   :  { %30 = dma.vmem_to_smem %s28_s10, 16, %s1945_s11, [#allocation2] }
   0x9   :  { %s32_s13 = sshll.u32 %s3680_s4, 4  ;;  %s1946_s14 = smov [#allocation7]   ;;  %s33_s13 = int_to_ptr.vmem [resolvable:$true] %s32_s13 }
   0xa   :  { %35 = dma.vmem_to_smem %s33_s13, 16, %s1946_s14, [#allocation2] }
   0xb   :  { %1900 = dma.done.wait [#allocation2], 80 }
   0xc   :  { %1901 = vsyncadd [#allocation2], 4294967216 }
   0xd   :  { %38 = sfence }
   0xe   :  { %39 = vsyncpa [#allocation9], 0 }
   0xf   :  { %41 = vsyncpa [#allocation9 + $0x1], 0 }
  0x10   :  { %42 = vsyncpa [#allocation10], 0 }
  0x11   :  { %44 = vsyncpa [#allocation10 + $0x1], 0  ;;  %s2001_s2 = smov 0   ;;  %s2003_s3 = smov 0  }
  0x12   :  { %s2005_s15 = smov 0   ;;  %s2007_s16 = smov 0  }
  0x13   :  { %s2009_s17 = smov 0   ;;  %s2011_s4 = smov 0  }
  0x14   :  { %s2013_s18 = smov 0  }
  0x15 LB: > { %3704 = sst [smem:[#allocation17_spill]] %s1912_s2  ;;  %s2035_s19 = sadd.s32 4294967295, %s1936_s18   ;;  %s1936_s18 = sphi %s2013_s18, %s3942_s18   ;;  %s1932_s4 = sphi %s2011_s4, %s3948_s4   ;;  %s1928_s17 = sphi %s2009_s17, %s3947_s17   ;;  %s1924_s16 = sphi %s2007_s16, %s3946_s16   ;;  %s1920_s15 = sphi %s2005_s15, %s3945_s15   ;;  %s1916_s3 = sphi %s2003_s3, %s3944_s3   ;;  %s1912_s2 = sphi %s2001_s2, %s3943_s2  }
  0x16   : > { %3705 = sst [smem:[#allocation18_spill]] %s1916_s3  ;;  %s1406_s20 = sadd.s32 4294967294, %s1936_s18  }
  0x17   : > { %3706 = sst [smem:[#allocation19_spill]] %s1920_s15  ;;  %s2039_s21 = sadd.s32 1, %s1936_s18  }
  0x18   : > { %3707 = sst [smem:[#allocation20_spill]] %s1928_s17  ;;  %s2042_s22 = sshll.u32 %s1936_s18, 3 }
  0x19   : > { %3708 = sst [smem:[#allocation21_spill]] %s1932_s4  ;;  %s1533_s24 = sadd.s32 8, %s2042_s22 }
  0x1a   : > { %3709 = sst [smem:[#allocation22_spill]] %s1936_s18  ;;  %s61_s26 = sadd.s32 1, %s1932_s4 }
  0x1b   : > { %3710 = sst [smem:[#allocation23_spill]] %s2035_s19  ;;  %p68_p0 = scmp.ne.s32.totalorder %s1932_s4, %s1928_s17 }
  0x1c   : > { %3711 = sst [smem:[#allocation24_spill]] %s2039_s21  ;;  %p69_p1 = scmp.eq.s32.totalorder %s1936_s18, 0 }
  0x1d   : > { %s55_s23 = sld [smem:[#allocation3 + %s2042_s22]]  ;;  %p74_p2 = scmp.ne.s32.totalorder %s1928_s17, %s1924_s16 }
  0x1e   : > { %s57_s25 = sld [smem:[#allocation3 + %s1533_s24]]  ;;  %p75_p3 = scmp.eq.s32.totalorder %s2035_s19, 0 }
  0x1f   : > { %p2052_p4 = por %p69_p1, %p68_p0  ;;  %s84_s28 = ssub.s32 %s1936_s18, %s2039_s21 }
  0x20   : > { %p2058_p5 = por %p75_p3, %p74_p2  ;;  %p85_p6 = scmp.eq.s32.totalorder %s84_s28, 0 }
  0x21   : > { %s87_s30 = sadd.s32 1, %s1920_s15  ;;  %p97_p7 = scmp.ne.s32.totalorder %s1920_s15, %s1916_s3 }
  0x22   : > { %p98_p8 = scmp.eq.s32.totalorder %s2035_s19, 1  ;;  %p103_p10 = scmp.ne.s32.totalorder %s1916_s3, %s1912_s2 }
  0x23   : > { %s2069_s8 = scalar_select %p85_p6, %s1920_s15, %s87_s30  }
  0x24   : > { %s58_s7 = ssub.s32 %s55_s23, %s57_s25  ;;  %p2074_p11 = por %p98_p8, %p97_p7 }
  0x25   : > { %p59_p9 = scmp.eq.s32.totalorder %s58_s7, 0  ;;  %3714 = sst [smem:[#allocation25_spill]] %s2069_s8 }
  0x26   : > { %s3716_s10 = scalar_select %p2074_p11, 1, 0 }
  0x27   : > { %s2072_s9 = scalar_select %p59_p9, %s1932_s4, %s61_s26  }
  0x28   : > { %3717 = sst [smem:[#allocation27_spill]] %s3716_s10  ;;  %p104_p12 = scmp.eq.s32.totalorder %s1406_s20, 1 }
  0x29   : > { %3715 = sst [smem:[#allocation26_spill]] %s2072_s9  ;;  %p1675_p0 = scmp.lt.s32.totalorder %s1936_s18, 2 }
  0x2a   : > { %p2080_p1 = por %p104_p12, %p103_p10  ;;  %s124_s11 = sand.u32 1, %s1932_s4  }
  0x2b   : > { %s1411_s1 = sshll.u32 %s124_s11, 7  ;;  %p2087_p2 = pnand %p1675_p0, %p2052_p4 }
  0x2c   : > { %s3718_s0 = scalar_select %p2080_p1, 1, 0 }
  0x2d   : > { %s1659_s13 = scalar_select %p2052_p4, [#allocation3], [#allocation12] }
  0x2e   : > { %3719 = sst [smem:[#allocation28_spill]] %s3718_s0  ;;  %s3950_s22 = smov (!%p2052_p4, %s2042_s22), 0 }
  0x2f   : > { %s3952_s13 = smov (!%p1675_p0, %s1659_s13), [#allocation13]  ;;  %s3954_s22 = smov (!%p1675_p0, %s3950_s22), 0 }
  0x30   : > { %s130_s14 = sld [smem:[%s3952_s13 + %s3954_s22]]  ;;  %s128_s16 = scalar_lea.vmem [#allocation8], %s1411_s1 }
  0x31   : > { %s2096_s20 = sshll.u32 %s128_s16, 4  ;;  %p1415_p3 = scmp.ge.s32.totalorder %s1936_s18, 1  ;;  %s139_s20 = int_to_ptr.vmem [resolvable:$true] %s2096_s20 }
  0x32   : > { %p146_p6 = scmp.lt.s32.totalorder %s1936_s18, 3  ;;  %s3722_s5 = sld [smem:[#allocation29_spill]] }
  0x33   : > { %s125_s22 = scalar_lea.sflag [#allocation9], %s124_s11  ;;  %p1814_p8 = pneg %p2087_p2 }
  0x34   : > { %p2100_p7 = pnand %p1415_p3, %p146_p6 }
  0x36   : > { %s1534_s24 = sshll.u32 %s130_s14, 7 }
  0x38   : > { %s135_s27 = scalar_lea.hbm %s3722_s5, %s1534_s24  ;;  %s1817_s16 = scalar_lea.hbm %s3722_s5, 256 }
  0x39   : > { %s136_s28 = sshll.u32 %s135_s27, 4  ;;  %s137_s28 = int_to_ptr.hbm [resolvable:$true] %s136_s28 }
  0x3a   : > { %s1810_s30 = sshra.s32 %s137_s28, 4  ;;  %s1811_s30 = int_to_ptr.hbm [resolvable:$true] %s1810_s30 }
  0x3b   : > { %s1812_s7 = scalar_lea.hbm %s1811_s30, 128  ;;  %p1818_p12 = scmp.lt.s32.totalorder %s1811_s30, %s3722_s5 }
  0x3c   : > { %p1813_p4 = scmp.ne.s32.totalorder %s1811_s30, %s1812_s7  ;;  %p1819_p0 = scmp.lt.s32.totalorder %s1817_s16, %s1812_s7 }
  0x3e   : > { %p1815_p9 = pnand %p1814_p8, %p1813_p4  ;;  %p1820_p3 = por %p1819_p0, %p1818_p12 }
  0x40   : > { %p1816_p10 = pneg %p1815_p9 }
  0x42   : > { %p1821_p6 = pnand %p1820_p3, %p1816_p10 }
  0x44   : > { %1824 = shalt.err (!%p1821_p6)
}
  0x45   : > { %s1947_s11 = smov 64   ;;  %s1948_s24 = smov 4  }
  0x46   : > { %1670 = dma.hbm_to_vmem [thread:$0]  (!%p2087_p2), %s137_s28, 2048, %s139_s20, %s125_s22, %s1947_s11, %s1947_s11, %s1948_s24  }
  0x47   : > { %150 = sbr.rel (%p2100_p7) target bundleno = 310 (0x136), region = 24  ;;  %s152_s25 = sand.u32 (!%p2100_p7), 1, %s1928_s17  }
  0x48   : > { %s1416_s26 = sshll.u32 (!%p2100_p7), %s152_s25, 7  ;;  %s153_s27 = scalar_lea.sflag (!%p2100_p7), [#allocation9], %s152_s25 }
  0x49   : > { %s2121_s1 = scalar_lea.vmem (!%p2100_p7), [#allocation8], %s1416_s26 }
  0x4c   : > { %1903 = dma.done.wait (%p2058_p5), %s153_s27, 2048  }
  0x4d   : > { %1905 = vsyncadd (%p2058_p5), %s153_s27, 4294965248  ;;  %s3681_s9 = sand.u32 1, %s1916_s3   ;;  %v180_v0 = vlaneseq  ;;  %s2138_s23 = smov 0  }
  0x4e   : > { %s2130_s12 = sshll.u32 %s3681_s9, 3 }
  0x4f   : > { %v2132_v1 = vshrl.u32 %v180_v0, 7 }
  0x51   : > { %v2135_v2 = vadd.s32 8, %v2132_v1 }
  0x52 LB: >> { %s3723_s19 = sld [smem:[#allocation23_spill]]  ;;  %s1940_s23 = sphi %s2138_s23, %s188_s23  }
  0x58   : >> { %s3682_s29 = sshll.u32 %s3723_s19, 3 }
  0x59   : >> { %s190_s28 = sadd.s32 %s1940_s23, %s3682_s29 }
  0x5a   : >> { %s2147_s22 = sshll.u32 %s190_s28, 2 }
  0x5b   : >> { %s2150_s30 = sld [smem:[#allocation4 + %s2147_s22]]  ;;  %s2159_s13 = sadd.s32 1, %s2147_s22 }
  0x5c   : >> { %s2153_s7 = sld [smem:[#allocation5 + %s2147_s22]]  ;;  %s2168_s11 = sadd.s32 2, %s2147_s22 }
  0x5d   : >> { %s2165_s14 = sld [smem:[#allocation6 + %s2147_s22]]  ;;  %s2318_s5 = sadd.s32 3, %s2147_s22 }
  0x5e   : >> { %s2248_s17 = sld [smem:[#allocation7 + %s2159_s13]] }
  0x5f   : >> { %s2294_s28 = sld [smem:[#allocation7 + %s2168_s11]] }
  0x60   : >> { %s2332_s21 = sld [smem:[#allocation6 + %s2318_s5]] }
  0x61   : >> { %p194_p5 = scmp.lt.s32.totalorder %s2150_s30, 9  ;;  %s2339_s20 = sld [smem:[#allocation7 + %s2318_s5]] }
  0x62   : >> { %p379_p2 = scmp.le.s32.totalorder %s2153_s7, %s2150_s30  ;;  %s2360_s18 = sld [smem:[#allocation5 + %s2159_s13]] }
  0x63   : >> { %s2162_s16 = scalar_select %p194_p5, %s2150_s30, 9  ;;  %v350_v47 = vstv %s2165_s14 }
  0x64   : >> { %vm2377_vm5 = vcmp.ge.s32.totalorder %v2132_v1, %v350_v47  ;;  %v394_v58 = vstv %s2248_s17  ;;  %vm2390_vm7 = vcmp.ge.s32.totalorder %v2135_v2, %v350_v47 }
  0x65   : >> { %p196_p7 = scmp.ge.s32.totalorder %s2162_s16, %s2150_s30  ;;  %p197_p4 = scmp.lt.s32.totalorder %s2162_s16, %s2153_s7  ;;  %vm2413_vm11 = vcmp.lt.s32.totalorder %v2132_v1, %v394_v58  ;;  %vm2445_vm14 = vcmp.lt.s32.totalorder %v2135_v2, %v394_v58 }
  0x66   : >> { %s1535_s24 = sshll.u32 %s2162_s16, 3  ;;  %s210_s25 = sadd.s32 1, %s2162_s16 }
  0x67   : >> { %p198_p8 = pnand %p197_p4, %p196_p7  ;;  %s2177_s26 = scalar_lea.vmem %s2121_s1, %s1535_s24 [#allocation8] }
  0x68   : >> { %p2180_p9 = scmp.ge.s32.totalorder %s210_s25, %s2150_s30  ;;  %p2185_p10 = scmp.lt.s32.totalorder %s210_s25, %s2153_s7  ;;  %v1635_v3 = vld [vmem:[%s2177_s26 + $0x8] sm:$0xff]   ;;  %v203_v4 = vld [vmem:[%s2177_s26] sm:$0xf]  ;;  %v204_v5 = vld [vmem:[%s2177_s26 + $0x4] sm:$0xf] }
  0x69   : >> { %s1422_s9 = scalar_select %p198_p8, 0, 1  ;;  %v1541_v7 = vunpack.c.l.bf16 %v1635_v3  ;;  %v1542_v8 = vunpack.c.h.bf16 %v1635_v3  ;;  %v1636_v16 = vld [vmem:[%s2177_s26 + $0x10] sm:$0xff]   ;;  %v1637_v28 = vld [vmem:[%s2177_s26 + $0x18] sm:$0xff]   ;;  %v1638_v40 = vld [vmem:[%s2177_s26 + $0x20] sm:$0xff]  }
  0x6a   : >> { %p213_p12 = pnand %p2185_p10, %p2180_p9  ;;  %s233_s24 = sadd.s32 2, %s2162_s16  ;;  %v1545_v19 = vunpack.c.l.bf16 %v1636_v16  ;;  %v1546_v20 = vunpack.c.h.bf16 %v1636_v16  ;;  %v1549_v31 = vunpack.c.l.bf16 %v1637_v28  ;;  %v1550_v32 = vunpack.c.h.bf16 %v1637_v28  ;;  %v1639_v54 = vld [vmem:[%s2177_s26 + $0x28] sm:$0xff]  }
  0x6b   : >> { %v206_v6 = vstv %s1422_s9  ;;  %p2198_p0 = scmp.ge.s32.totalorder %s233_s24, %s2150_s30  ;;  %p2203_p3 = scmp.lt.s32.totalorder %s233_s24, %s2153_s7  ;;  %v1553_v43 = vunpack.c.l.bf16 %v1638_v40  ;;  %v1554_v44 = vunpack.c.h.bf16 %v1638_v40  ;;  %v1557_v63 = vunpack.c.l.bf16 %v1639_v54 }
  0x6c   : >> { %vm207_vm0 = vcmp.eq.s32.totalorder %v206_v6, 1  ;;  %s1426_s27 = scalar_select %p213_p12, 0, 1  ;;  %v1558_v0 = vunpack.c.h.bf16 %v1639_v54 }
  0x6d   : >> { %v208_v9 = vsel %vm207_vm0, %v203_v4, 4286644096  ;;  %v209_v10 = vsel %vm207_vm0, %v204_v5, 4286644096  ;;  %p236_p6 = pnand %p2203_p3, %p2198_p0  ;;  %s256_s9 = sadd.s32 3, %s2162_s16 }
  0x6e   : >> { %v220_v11 = vunpack.c.l.bf16 %v208_v9  ;;  %v221_v12 = vunpack.c.l.bf16 %v209_v10  ;;  %v229_v13 = vstv %s1426_s27  ;;  %p2213_p5 = scmp.ge.s32.totalorder %s256_s9, %s2150_s30  ;;  %p2218_p7 = scmp.lt.s32.totalorder %s256_s9, %s2153_s7 }
  0x6f   : >> { %s2222_s29 = scalar_select %p236_p6, 0, 1  ;;  %vm230_vm1 = vcmp.eq.s32.totalorder %v229_v13, 1 }
  0x70   : >> { %v224_v14 = vmax.f32 %v220_v11, %v1541_v7  ;;  %v225_v15 = vmax.f32 %v221_v12, %v1542_v8  ;;  %s279_s25 = sadd.s32 4, %s2162_s16  ;;  %s2227_s27 = sld [smem:[#allocation7 + %s2147_s22]]  ;;  %v433_v11 = vstv %s2294_s28  ;;  %v1640_v12 = vld [vmem:[%s2177_s26 + $0x30] sm:$0xff]  }
  0x71   : >> { %p259_p4 = pnand %p2218_p7, %p2213_p5  ;;  %s2234_s9 = sld [smem:[#allocation6 + %s2159_s13]]  ;;  %v252_v25 = vstv %s2222_s29 }
  0x72   : >> { %v226_v17 = vpack.c.bf16 %v224_v14, %v224_v14  ;;  %v227_v18 = vpack.c.bf16 %v225_v15, %v225_v15  ;;  %p2237_p8 = scmp.ge.s32.totalorder %s279_s25, %s2150_s30  ;;  %p2242_p9 = scmp.lt.s32.totalorder %s279_s25, %s2153_s7  ;;  %vm253_vm2 = vcmp.eq.s32.totalorder %v252_v25, 1  ;;  %v1561_v25 = vunpack.c.l.bf16 %v1640_v12 }
  0x73   : >> { %s302_s4 = sadd.s32 5, %s2162_s16  ;;  %s2352_s25 = sld [smem:[#allocation4 + %s2159_s13]] }
  0x74   : >> { %v231_v21 = vsel %vm230_vm1, %v226_v17, %v208_v9  ;;  %v232_v22 = vsel %vm230_vm1, %v227_v18, %v209_v10  ;;  %p2251_p10 = scmp.ge.s32.totalorder %s302_s4, %s2150_s30  ;;  %p2256_p12 = scmp.lt.s32.totalorder %s302_s4, %s2153_s7 }
  0x75   : >> { %v243_v23 = vunpack.c.l.bf16 %v231_v21  ;;  %v244_v24 = vunpack.c.l.bf16 %v232_v22  ;;  %s2266_s15 = scalar_select %p259_p4, 0, 1 }
  0x76   : >> { %p282_p0 = pnand %p2242_p9, %p2237_p8  ;;  %s325_s4 = sadd.s32 6, %s2162_s16  ;;  %v353_v51 = vstv %s2227_s27 }
  0x77   : >> { %v247_v26 = vmax.f32 %v243_v23, %v1545_v19  ;;  %v248_v27 = vmax.f32 %v244_v24, %v1546_v20  ;;  %p2275_p3 = scmp.ge.s32.totalorder %s325_s4, %s2150_s30  ;;  %p2280_p6 = scmp.lt.s32.totalorder %s325_s4, %s2153_s7  ;;  %v275_v37 = vstv %s2266_s15  ;;  %v391_v55 = vstv %s2234_s9 }
  0x78   : >> { %p305_p5 = pnand %p2256_p12, %p2251_p10  ;;  %s2289_s16 = sld [smem:[#allocation6 + %s2168_s11]]  ;;  %vm276_vm3 = vcmp.eq.s32.totalorder %v275_v37, 1  ;;  %vm2382_vm6 = vcmp.lt.s32.totalorder %v2132_v1, %v353_v51  ;;  %vm2395_vm8 = vcmp.lt.s32.totalorder %v2135_v2, %v353_v51  ;;  %vm2401_vm9 = vcmp.ge.s32.totalorder %v2132_v1, %v391_v55 }
  0x79   : >> { %v249_v29 = vpack.c.bf16 %v247_v26, %v247_v26  ;;  %v250_v30 = vpack.c.bf16 %v248_v27, %v248_v27  ;;  %p3699_p7 = scmp.le.s32.totalorder %s2227_s27, %s2165_s14  ;;  %p328_p4 = pnand %p2280_p6, %p2275_p3  ;;  %vm356_vm10 = vmand %vm2377_vm5, %vm2382_vm6  ;;  %vm2440_vm13 = vcmp.ge.s32.totalorder %v2135_v2, %v391_v55  ;;  %v472_v26 = vstv %s2339_s20 }
  0x7a   : >> { %s2301_s29 = scalar_select %p282_p0, 0, 1  ;;  %vm357_vm12 = vmand %vm2390_vm7, %vm2395_vm8  ;;  %v1562_v27 = vunpack.c.h.bf16 %v1640_v12  ;;  %vm2536_vm8 = vcmp.lt.s32.totalorder %v2135_v2, %v433_v11 }
  0x7b   : >> { %v254_v33 = vsel %vm253_vm2, %v249_v29, %v231_v21  ;;  %v255_v34 = vsel %vm253_vm2, %v250_v30, %v232_v22  ;;  %s2313_s4 = scalar_select %p305_p5, 0, 1  ;;  %vm397_vm15 = vmand %vm2401_vm9, %vm2413_vm11  ;;  %v469_v22 = vstv %s2332_s21 }
  0x7c   : >> { %v266_v35 = vunpack.c.l.bf16 %v254_v33  ;;  %v267_v36 = vunpack.c.l.bf16 %v255_v34  ;;  %p3697_p8 = scmp.le.s32.totalorder %s2248_s17, %s2234_s9  ;;  %p2327_p9 = por %p3699_p7, %p379_p2  ;;  %v298_v50 = vstv %s2301_s29  ;;  %vm2469_vm1 = vmpackc.low %vm356_vm10, %vm356_vm10  ;;  %vm2552_vm10 = vcmp.ge.s32.totalorder %v2132_v1, %v469_v22 }
  0x7d   : >> { %s2334_s8 = scalar_select %p328_p4, 0, 1  ;;  %vm299_vm4 = vcmp.eq.s32.totalorder %v298_v50, 1  ;;  %v321_v6 = vstv %s2313_s4  ;;  %vm2479_vm2 = vmpackc.low %vm357_vm12, %vm357_vm12  ;;  %vm2557_vm11 = vcmp.ge.s32.totalorder %v2135_v2, %v469_v22 }
  0x7e   : >> { %v270_v38 = vmax.f32 %v266_v35, %v1549_v31  ;;  %v271_v39 = vmax.f32 %v267_v36, %v1550_v32  ;;  %p3691_p10 = scmp.le.s32.totalorder %s2294_s28, %s2289_s16  ;;  %p2347_p12 = por %p3697_p8, %p379_p2  ;;  %v430_v10 = vstv %s2289_s16  ;;  %vm2459_vm0 = vcmp.eq.s32.totalorder %v321_v6, 1  ;;  %vm398_vm5 = vmand %vm2440_vm13, %vm2445_vm14 }
  0x7f   : >> { %p3690_p3 = scmp.le.s32.totalorder %s2339_s20, %s2332_s21  ;;  %p507_p6 = scmp.lt.s32.totalorder %s2352_s25, 9  ;;  %v344_v28 = vstv %s2334_s8  ;;  %vm2526_vm6 = vmpackc.low %vm397_vm15, %vm397_vm15  ;;  %vm2531_vm7 = vcmp.ge.s32.totalorder %v2135_v2, %v430_v10  ;;  %vm2579_vm15 = vcmp.lt.s32.totalorder %v2132_v1, %v472_v26  ;;  %vm2598_vm14 = vcmp.lt.s32.totalorder %v2135_v2, %v472_v26 }
  0x80   : >> { %v272_v41 = vpack.c.bf16 %v270_v38, %v270_v38  ;;  %v273_v42 = vpack.c.bf16 %v271_v39, %v271_v39  ;;  %p2368_p0 = por %p3691_p10, %p379_p2  ;;  %vm2574_vm12 = vmpackc.low %vm398_vm5, %vm398_vm5  ;;  %s2700_s15 = sld [smem:[#allocation4 + %s2168_s11]] }
  0x81   : >> { %s2418_s29 = scalar_select %p507_p6, %s2352_s25, 9  ;;  %vm437_vm13 = vmand %vm2531_vm7, %vm2536_vm8 }
  0x82   : >> { %v277_v45 = vsel %vm276_vm3, %v272_v41, %v254_v33  ;;  %v278_v46 = vsel %vm276_vm3, %v273_v42, %v255_v34  ;;  %p2432_p5 = por %p3690_p3, %p379_p2  ;;  %vm2484_vm3 = vcmp.ge.s32.totalorder %v2132_v1, %v430_v10  ;;  %s2725_s26 = sld [smem:[#allocation5 + %s2168_s11]] }
  0x83   : >> { %v289_v48 = vunpack.c.l.bf16 %v277_v45  ;;  %v290_v49 = vunpack.c.l.bf16 %v278_v46  ;;  %p509_p2 = scmp.ge.s32.totalorder %s2418_s29, %s2352_s25  ;;  %p510_p6 = scmp.lt.s32.totalorder %s2418_s29, %s2360_s18 }
  0x84   : >> { %s1536_s30 = sshll.u32 %s2418_s29, 3  ;;  %s523_s7 = sadd.s32 1, %s2418_s29 }
  0x85   : >> { %v293_v52 = vmax.f32 %v289_v48, %v1553_v43  ;;  %v294_v53 = vmax.f32 %v290_v49, %v1554_v44  ;;  %p2497_p13 = pnand %p510_p6, %p509_p2  ;;  %s2502_s13 = scalar_lea.vmem %s2121_s1, %s1536_s30 [#allocation8] }
  0x86   : >> { %p2510_p3 = scmp.ge.s32.totalorder %s523_s7, %s2352_s25  ;;  %p2515_p2 = scmp.lt.s32.totalorder %s523_s7, %s2360_s18  ;;  %v1641_v32 = vld [vmem:[%s2502_s13 + $0x8] sm:$0xff]   ;;  %v516_v37 = vld [vmem:[%s2502_s13] sm:$0xf]  ;;  %v517_v38 = vld [vmem:[%s2502_s13 + $0x4] sm:$0xf] }
  0x87   : >> { %v295_v59 = vpack.c.bf16 %v293_v52, %v293_v52  ;;  %v296_v60 = vpack.c.bf16 %v294_v53, %v294_v53  ;;  %s1449_s8 = scalar_select %p2497_p13, 0, 1  ;;  %v2626_v52 = vld [vmem:[%s2502_s13 + $0x10] sm:$0xff]  }
  0x88   : >> { %p526_p13 = pnand %p2515_p2, %p2510_p3  ;;  %s546_s7 = sadd.s32 2, %s2418_s29 }
  0x89   : >> { %v300_v4 = vsel %vm299_vm4, %v295_v59, %v277_v45  ;;  %v301_v5 = vsel %vm299_vm4, %v296_v60, %v278_v46  ;;  %vm2489_vm4 = vcmp.lt.s32.totalorder %v2132_v1, %v433_v11  ;;  %v519_v43 = vstv %s1449_s8  ;;  %p2584_p6 = scmp.ge.s32.totalorder %s546_s7, %s2352_s25  ;;  %p2589_p10 = scmp.lt.s32.totalorder %s546_s7, %s2360_s18 }
  0x8a   : >> { %v312_v8 = vunpack.c.l.bf16 %v300_v4  ;;  %v313_v9 = vunpack.c.l.bf16 %v301_v5  ;;  %vm436_vm9 = vmand %vm2484_vm3, %vm2489_vm4  ;;  %v1565_v45 = vunpack.c.l.bf16 %v1641_v32  ;;  %v1566_v46 = vunpack.c.h.bf16 %v1641_v32  ;;  %s1453_s8 = scalar_select %p526_p13, 0, 1 }
  0x8b   : >> { %vm2613_vm5 = vmpackc.low %vm436_vm9, %vm436_vm9  ;;  %p549_p3 = pnand %p2589_p10, %p2584_p6  ;;  %s569_s24 = sadd.s32 3, %s2418_s29  ;;  %vm2629_vm3 = vcmp.eq.s32.totalorder %v344_v28, 1 }
  0x8c   : >> { %v316_v15 = vmax.f32 %v312_v8, %v1557_v63  ;;  %v317_v16 = vmax.f32 %v313_v9, %v1558_v0  ;;  %vm475_vm4 = vmand %vm2552_vm10, %vm2579_vm15  ;;  %v542_v56 = vstv %s1453_s8  ;;  %p2640_p2 = scmp.ge.s32.totalorder %s569_s24, %s2352_s25  ;;  %p2645_p13 = scmp.lt.s32.totalorder %s569_s24, %s2360_s18  ;;  %v1569_v63 = vunpack.c.l.bf16 %v2626_v52 }
  0x8d   : >> { %s3793_s10 = scalar_select %p2327_p9, 1, 0  ;;  %vm476_vm9 = vmand %vm2557_vm11, %vm2598_vm14  ;;  %vm2677_vm7 = vcmp.eq.s32.totalorder %v542_v56, 1  ;;  %v1570_v0 = vunpack.c.h.bf16 %v2626_v52  ;;  %vm3802_vm11 = vcmask 261120  }
  0x8e   : >> { %v318_v23 = vpack.c.bf16 %v316_v15, %v316_v15  ;;  %v319_v24 = vpack.c.bf16 %v317_v16, %v317_v16  ;;  %s2669_s8 = scalar_select %p549_p3, 0, 1  ;;  %vm2693_vm8 = vmpackc.low %vm475_vm4, %vm475_vm4 }
  0x8f   : >> { %v2652_v59 = vstv %s3793_s10  ;;  %s592_s2 = sadd.s32 4, %s2418_s29  ;;  %vm2716_vm10 = vmpackc.low %vm476_vm9, %vm476_vm9  ;;  %p572_p9 = pnand %p2645_p13, %p2640_p2 }
  0x90   : >> { %v323_v33 = vsel %vm2459_vm0, %v318_v23, %v300_v4  ;;  %v324_v34 = vsel %vm2459_vm0, %v319_v24, %v301_v5  ;;  %vm520_vm0 = vcmp.eq.s32.totalorder %v519_v43, 1  ;;  %v565_v7 = vstv %s2669_s8  ;;  %vm3803_vm15 = vmmov %vm3802_vm11  ;;  %p2737_p10 = scmp.ge.s32.totalorder %s592_s2, %s2352_s25  ;;  %s615_s24 = sadd.s32 5, %s2418_s29 }
  0x91   : >> { %v335_v39 = vunpack.c.l.bf16 %v323_v33  ;;  %v336_v40 = vunpack.c.l.bf16 %v324_v34  ;;  %v2617_v50 = vsel %vm520_vm0, %v516_v37, 4286644096  ;;  %v2619_v51 = vsel %vm520_vm0, %v517_v38, 4286644096  ;;  %vm2660_vm0 = vmpackc.low %vm437_vm13, %vm437_vm13  ;;  %p2746_p6 = scmp.lt.s32.totalorder %s592_s2, %s2360_s18  ;;  %s638_s3 = sadd.s32 6, %s2418_s29 }
  0x92   : >> { %v533_v54 = vunpack.c.l.bf16 %v2617_v50  ;;  %v534_v55 = vunpack.c.l.bf16 %v2619_v51  ;;  %vm3804_vm13 = vmmov %vm3802_vm11  ;;  %s2757_s6 = scalar_select %p572_p9, 0, 1 }
  0x93   : >> { %v339_v47 = vmax.f32 %v335_v39, %v1561_v25  ;;  %v340_v48 = vmax.f32 %v336_v40, %v1562_v27  ;;  %vm3806_vm14 = vmmov %vm3802_vm11  ;;  %p2764_p3 = scmp.ge.s32.totalorder %s615_s24, %s2352_s25  ;;  %p2769_p8 = scmp.lt.s32.totalorder %s615_s24, %s2360_s18 }
  0x94   : >> { %v537_v61 = vmax.f32 %v533_v54, %v1565_v45  ;;  %v538_v6 = vmax.f32 %v534_v55, %v1566_v46  ;;  %p2776_p2 = scmp.ge.s32.totalorder %s638_s3, %s2352_s25  ;;  %p2784_p13 = scmp.lt.s32.totalorder %s638_s3, %s2360_s18  ;;  %v1643_v55 = vld [vmem:[%s2502_s13 + $0x18] sm:$0xff]  }
  0x95   : >> { %v341_v57 = vpack.c.bf16 %v339_v47, %v339_v47  ;;  %v342_v58 = vpack.c.bf16 %v340_v48, %v340_v48  ;;  %s3816_s24 = scalar_select %p2347_p12, 1, 0 }
  0x96   : >> { %v539_v11 = vpack.c.bf16 %v537_v61, %v537_v61  ;;  %v540_v38 = vpack.c.bf16 %v538_v6, %v538_v6  ;;  %s2801_s3 = sld [smem:[#allocation4 + %s2318_s5]]  ;;  %p748_p12 = scmp.lt.s32.totalorder %s2700_s15, 9 }
  0x97   : >> { %v346_v3 = vsel %vm2629_vm3, %v341_v57, %v323_v33  ;;  %v347_v4 = vsel %vm2629_vm3, %v342_v58, %v324_v34  ;;  %vm3808_vm3 = vmmov %vm3802_vm11  ;;  %v2793_v53 = vstv %s3816_s24  ;;  %s3817_s22 = scalar_select %p2368_p0, 1, 0 }
  0x98   : >> { %v364_v8 = vsel %vm2469_vm1, %v346_v3, 4286644096  ;;  %v365_v9 = vsel %vm2479_vm2, %v347_v4, 4286644096  ;;  %v405_v10 = vsel %vm2526_vm6, %v346_v3, 4286644096  ;;  %vm3809_vm4 = vmmov %vm3808_vm3  ;;  %v544_v39 = vsel %vm2677_vm7, %v539_v11, %v2617_v50  ;;  %p3820_p0 = scmp.le.s32.totalorder %s2360_s18, %s2352_s25  ;;  %p641_p4 = pnand %p2784_p13, %p2776_p2 }
  0x99   : >> { %v366_v12 = vunpack.c.l.bf16 %v364_v8  ;;  %v367_v13 = vunpack.c.l.bf16 %v365_v9  ;;  %v406_v14 = vsel %vm2574_vm12, %v347_v4, 4286644096  ;;  %v407_v15 = vunpack.c.l.bf16 %v405_v10  ;;  %vm3812_vm9 = vmmov %vm3808_vm3  ;;  %s2815_s24 = sld [smem:[#allocation5 + %s2318_s5]]  ;;  %p3822_p1 = scmp.le.s32.totalorder %s2248_s17, %s2234_s9 }
  0x9a   : >> { %v408_v17 = vunpack.c.l.bf16 %v406_v14  ;;  %v444_v20 = vsel %vm2613_vm5, %v346_v3, 4286644096  ;;  %v445_v21 = vsel %vm2660_vm0, %v347_v4, 4286644096  ;;  %v483_v22 = vsel %vm2693_vm8, %v346_v3, 4286644096  ;;  %p2831_p9 = por %p3820_p0, %p3699_p7  ;;  %p3823_p11 = pmov %p3820_p0 }
  0x9b   : >> { %v369_v23 = vsel %vm3802_vm11, %v366_v12, -inf  ;;  %v370_v24 = vsel %vm3803_vm15, %v367_v13, -inf  ;;  %v409_v25 = vsel %vm3804_vm13, %v407_v15, -inf  ;;  %v446_v26 = vunpack.c.l.bf16 %v444_v20  ;;  %vm3813_vm11 = vmmov %vm3808_vm3  ;;  %p3825_p7 = pnand %p2746_p6, %p2737_p10 }
  0x9c   : >> { %v371_v27 = vmax.f32 %v369_v23, %v370_v24  ;;  %v410_v28 = vsel %vm3806_vm14, %v408_v17, -inf  ;;  %v447_v30 = vunpack.c.l.bf16 %v445_v21  ;;  %v484_v31 = vsel %vm2716_vm10, %v347_v4, 4286644096  ;;  %p2847_p0 = por %p3823_p11, %p3822_p1  ;;  %p3826_p11 = pnand %p2769_p8, %p2764_p3 }
  0x9d   : >> { %v411_v32 = vmax.f32 %v409_v25, %v410_v28  ;;  %v448_v33 = vsel %vm3808_vm3, %v446_v26, -inf  ;;  %v485_v34 = vunpack.c.l.bf16 %v483_v22  ;;  %v486_v35 = vunpack.c.l.bf16 %v484_v31  ;;  %s2856_s8 = scalar_select %p3825_p7, 0, 1  ;;  %v1644_v31 = vld [vmem:[%s2502_s13 + $0x20] sm:$0xff]  }
  0x9e   : >> { %v372_v36 = vrot.slane %v371_v27, 4  ;;  %v449_v37 = vsel %vm3809_vm4, %v447_v30, -inf  ;;  %v545_v47 = vsel %vm2677_vm7, %v540_v38, %v2619_v51  ;;  %v556_v48 = vunpack.c.l.bf16 %v544_v39  ;;  %s2873_s10 = scalar_select %p748_p12, %s2700_s15, 9 }
  0x9f   : >> { %v412_v40 = vrot.slane %v411_v32, 4  ;;  %v450_v42 = vmax.f32 %v448_v33, %v449_v37  ;;  %v487_v43 = vsel %vm3812_vm9, %v485_v34, -inf  ;;  %v488_v44 = vsel %vm3813_vm11, %v486_v35, -inf  ;;  %s3827_s11 = scalar_select %p2432_p5, 1, 0 }
  0xa0   : >> { %v373_v45 = vmax.f32 %v371_v27, %v372_v36  ;;  %v489_v46 = vmax.f32 %v487_v43, %v488_v44  ;;  %v557_v51 = vunpack.c.l.bf16 %v545_v47  ;;  %v2806_v57 = vstv %s3817_s22  ;;  %s2866_s22 = scalar_select %p3826_p11, 0, 1 }
  0xa1   : >> { %v413_v50 = vmax.f32 %v411_v32, %v412_v40  ;;  %v451_v54 = vrot.slane %v450_v42, 4  ;;  %v560_v61 = vmax.f32 %v556_v48, %v1569_v63  ;;  %vm2821_vm7 = vcmp.eq.s32.totalorder %v565_v7, 1  ;;  %p750_p1 = scmp.ge.s32.totalorder %s2873_s10, %s2700_s15  ;;  %p751_p7 = scmp.lt.s32.totalorder %s2873_s10, %s2725_s26  ;;  %v2902_v40 = vld [vmem:[%s2502_s13 + $0x28] sm:$0xff]  }
  0xa2   : >> { %v374_v56 = vrot.slane %v373_v45, 2  ;;  %v490_v58 = vrot.slane %v489_v46, 4  ;;  %v561_v4 = vmax.f32 %v557_v51, %v1570_v0  ;;  %vm385_vm15 = vcmp.eq.s32.totalorder %v2652_v59, 1  ;;  %s1537_s4 = sshll.u32 %s2873_s10, 3  ;;  %s764_s29 = sadd.s32 1, %s2873_s10 }
  0xa3   : >> { %v414_v62 = vrot.slane %v413_v50, 2  ;;  %v452_v3 = vmax.f32 %v450_v42, %v451_v54  ;;  %v562_v0 = vpack.c.bf16 %v560_v61, %v560_v61  ;;  %v1573_v8 = vunpack.c.l.bf16 %v1643_v55  ;;  %p2907_p8 = pnand %p751_p7, %p750_p1  ;;  %s2912_s7 = scalar_lea.vmem %s2121_s1, %s1537_s4 [#allocation8] }
  0xa4   : >> { %v375_v63 = vmax.f32 %v373_v45, %v374_v56  ;;  %v491_v52 = vmax.f32 %v489_v46, %v490_v58  ;;  %v563_v10 = vpack.c.bf16 %v561_v4, %v561_v4  ;;  %v1574_v11 = vunpack.c.h.bf16 %v1643_v55  ;;  %p2915_p5 = scmp.ge.s32.totalorder %s764_s29, %s2700_s15  ;;  %v1647_v46 = vld [vmem:[%s2912_s7 + $0x8] sm:$0xff]   ;;  %v757_v61 = vld [vmem:[%s2912_s7] sm:$0xf]  ;;  %s787_s4 = sadd.s32 2, %s2873_s10 }
  0xa5   : >> { %v415_v7 = vmax.f32 %v413_v50, %v414_v62  ;;  %v453_v9 = vrot.slane %v452_v3, 2  ;;  %v567_v14 = vsel %vm2821_vm7, %v562_v0, %v544_v39  ;;  %v588_v15 = vstv %s2757_s6  ;;  %s2881_s6 = scalar_select %p641_p4, 0, 1  ;;  %v758_v62 = vld [vmem:[%s2912_s7 + $0x4] sm:$0xf] }
  0xa6   : >> { %v376_v12 = vrot.slane %v375_v63, 1  ;;  %v492_v13 = vrot.slane %v491_v52, 2  ;;  %v568_v21 = vsel %vm2821_vm7, %v563_v10, %v545_v47  ;;  %v579_v22 = vunpack.c.l.bf16 %v567_v14  ;;  %p2920_p4 = scmp.lt.s32.totalorder %s764_s29, %s2725_s26  ;;  %p2947_p6 = scmp.ge.s32.totalorder %s787_s4, %s2700_s15 }
  0xa7   : >> { %v416_v17 = vrot.slane %v415_v7, 1  ;;  %v454_v20 = vmax.f32 %v452_v3, %v453_v9  ;;  %vm424_vm13 = vcmp.eq.s32.totalorder %v2793_v53, 1  ;;  %v580_v25 = vunpack.c.l.bf16 %v568_v21  ;;  %p2952_p3 = scmp.lt.s32.totalorder %s787_s4, %s2725_s26  ;;  %p3839_p11 = scmp.le.s32.totalorder %s2294_s28, %s2289_s16 }
  0xa8   : >> { %v377_v23 = vmax.f32 %v375_v63, %v376_v12  ;;  %v493_v24 = vmax.f32 %v491_v52, %v492_v13  ;;  %vm463_vm14 = vcmp.eq.s32.totalorder %v2806_v57, 1  ;;  %v2887_v28 = vstv %s3827_s11  ;;  %s1476_s11 = scalar_select %p2907_p8, 0, 1 }
  0xa9   : >> { %v417_v26 = vmax.f32 %v415_v7, %v416_v17  ;;  %v455_v27 = vrot.slane %v454_v20, 1  ;;  %v583_v30 = vmax.f32 %v579_v22, %v1573_v8  ;;  %v584_v34 = vmax.f32 %v580_v25, %v1574_v11  ;;  %p767_p10 = pnand %p2920_p4, %p2915_p5  ;;  %p790_p2 = pnand %p2952_p3, %p2947_p6 }
  0xaa   : >> { %v378_v32 = vpack.c.bf16 %v377_v23, %v377_v23  ;;  %v494_v33 = vrot.slane %v493_v24, 1  ;;  %vm2894_vm3 = vcmp.eq.s32.totalorder %v588_v15, 1  ;;  %v611_v39 = vstv %s2856_s8  ;;  %s810_s8 = sadd.s32 3, %s2873_s10  ;;  %v2970_v15 = vld [vmem:[%s2502_s13 + $0x30] sm:$0xff]   ;;  %p3840_p1 = scmp.le.s32.totalorder %s2360_s18, %s2352_s25 }
  0xab   : >> { %v418_v36 = vpack.c.bf16 %v417_v26, %v417_v26  ;;  %v456_v37 = vmax.f32 %v454_v20, %v455_v27  ;;  %v585_v38 = vpack.c.bf16 %v583_v30, %v583_v30  ;;  %v586_v44 = vpack.c.bf16 %v584_v34, %v584_v34  ;;  %s2956_s2 = scalar_select %p767_p10, 0, 1 }
  0xac   : >> { %v382_v42 = vunpack.c.l.bf16 %v378_v32  ;;  %v495_v43 = vmax.f32 %v493_v24, %v494_v33  ;;  %v1577_v45 = vunpack.c.l.bf16 %v1644_v31  ;;  %vm502_vm4 = vcmp.eq.s32.totalorder %v2887_v28, 1  ;;  %p2974_p13 = scmp.ge.s32.totalorder %s810_s8, %s2700_s15  ;;  %p2979_p12 = scmp.lt.s32.totalorder %s810_s8, %s2725_s26 }
  0xad   : >> { %v421_v47 = vunpack.c.l.bf16 %v418_v36  ;;  %v457_v48 = vpack.c.bf16 %v456_v37, %v456_v37  ;;  %v590_v50 = vsel %vm2894_vm3, %v585_v38, %v567_v14  ;;  %v1578_v54 = vunpack.c.h.bf16 %v1644_v31  ;;  %p2993_p7 = por %p3840_p1, %p3839_p11  ;;  %v1648_v31 = vld [vmem:[%s2912_s7 + $0x10] sm:$0xff]   ;;  %p3848_p4 = scmp.le.s32.totalorder %s2339_s20, %s2332_s21 }
  0xae   : >> { %v591_v51 = vsel %vm2894_vm3, %v586_v44, %v568_v21  ;;  %v602_v55 = vunpack.c.l.bf16 %v590_v50  ;;  %vm2932_vm9 = vcmp.eq.s32.totalorder %v611_v39, 1  ;;  %v1581_v58 = vunpack.c.l.bf16 %v2902_v40  ;;  %p3849_p10 = pmov %p3840_p1  ;;  %p813_p3 = pnand %p2979_p12, %p2974_p13 }
  0xaf   : >> { %v386_v3 = vsel %vm385_vm15, 0.0, %v382_v42  ;;  %v603_v4 = vunpack.c.l.bf16 %v591_v51  ;;  %v760_v6 = vstv %s1476_s11  ;;  %v1589_v63 = vunpack.c.l.bf16 %v1647_v46  ;;  %s678_s11 = scalar_select %p2831_p9, 1, 0 }
  0xb0   : >> { %v460_v52 = vunpack.c.l.bf16 %v457_v48  ;;  %v496_v0 = vpack.c.bf16 %v495_v43, %v495_v43  ;;  %v606_v59 = vmax.f32 %v602_v55, %v1577_v45  ;;  %vm761_vm11 = vcmp.eq.s32.totalorder %v760_v6, 1  ;;  %p3034_p6 = por %p3849_p10, %p3848_p4  ;;  %v3054_v55 = vld [vmem:[%s2912_s7 + $0x18] sm:$0xff]   ;;  %p1157_p11 = scmp.le.s32.totalorder %s2815_s24, %s2801_s3 }
  0xb1   : >> { %v425_v8 = vsel %vm424_vm13, 0.0, %v421_v47  ;;  %v607_v7 = vmax.f32 %v603_v4, %v1578_v54  ;;  %v762_v9 = vsel %vm761_vm11, %v757_v61, 4286644096  ;;  %v763_v10 = vsel %vm761_vm11, %v758_v62, 4286644096  ;;  %s879_s8 = sadd.s32 6, %s2873_s10 }
  0xb2   : >> { %v608_v11 = vpack.c.bf16 %v606_v59, %v606_v59  ;;  %v1582_v12 = vunpack.c.h.bf16 %v2902_v40  ;;  %v634_v53 = vstv %s2866_s22  ;;  %v1590_v13 = vunpack.c.h.bf16 %v1647_v46  ;;  %s833_s22 = sadd.s32 4, %s2873_s10  ;;  %p3229_p4 = scmp.lt.s32.totalorder %s879_s8, %s2725_s26 }
  0xb3   : >> { %v609_v14 = vpack.c.bf16 %v607_v7, %v607_v7  ;;  %v774_v17 = vunpack.c.l.bf16 %v762_v9  ;;  %v775_v20 = vunpack.c.l.bf16 %v763_v10  ;;  %v783_v21 = vstv %s2956_s2  ;;  %s3006_s2 = scalar_select %p790_p2, 0, 1 }
  0xb4   : >> { %v426_v22 = vadd.f32 %v425_v8, %v386_v3  ;;  %v464_v23 = vsel %vm463_vm14, 0.0, %v460_v52  ;;  %v499_v24 = vunpack.c.l.bf16 %v496_v0  ;;  %v613_v25 = vsel %vm2932_vm9, %v608_v11, %v590_v50  ;;  %p3018_p8 = scmp.ge.s32.totalorder %s833_s22, %s2700_s15  ;;  %p3023_p5 = scmp.lt.s32.totalorder %s833_s22, %s2725_s26  ;;  %v3087_v8 = vld [vmem:[%s2912_s7 + $0x20] sm:$0xff]  }
  0xb5   : >> { %v614_v57 = vsel %vm2932_vm9, %v609_v14, %v591_v51  ;;  %v625_v26 = vunpack.c.l.bf16 %v613_v25  ;;  %v778_v27 = vmax.f32 %v774_v17, %v1589_v63  ;;  %v779_v30 = vmax.f32 %v775_v20, %v1590_v13  ;;  %s699_s18 = scalar_select %p2847_p0, 1, 0 }
  0xb6   : >> { %v626_v32 = vunpack.c.l.bf16 %v614_v57  ;;  %vm3008_vm7 = vcmp.eq.s32.totalorder %v634_v53, 1  ;;  %v1585_v34 = vunpack.c.l.bf16 %v2970_v15  ;;  %vm3013_vm15 = vcmp.eq.s32.totalorder %v783_v21, 1  ;;  %s720_s25 = scalar_select %p2993_p7, 1, 0 }
  0xb7   : >> { %v629_v36 = vmax.f32 %v625_v26, %v1581_v58  ;;  %v657_v37 = vstv %s2881_s6  ;;  %v780_v38 = vpack.c.bf16 %v778_v27, %v778_v27  ;;  %v781_v39 = vpack.c.bf16 %v779_v30, %v779_v30  ;;  %p836_p2 = pnand %p3023_p5, %p3018_p8  ;;  %s856_s6 = sadd.s32 5, %s2873_s10 }
  0xb8   : >> { %v465_v40 = vadd.f32 %v464_v23, %v426_v22  ;;  %v503_v42 = vsel %vm502_vm4, 0.0, %v499_v24  ;;  %v630_v43 = vmax.f32 %v626_v32, %v1582_v12  ;;  %v1593_v44 = vunpack.c.l.bf16 %v1648_v31  ;;  %s3073_s22 = scalar_select %p813_p3, 0, 1 }
  0xb9   : >> { %v631_v45 = vpack.c.bf16 %v629_v36, %v629_v36  ;;  %v785_v46 = vsel %vm3013_vm15, %v780_v38, %v762_v9  ;;  %v786_v47 = vsel %vm3013_vm15, %v781_v39, %v763_v10  ;;  %v1594_v48 = vunpack.c.h.bf16 %v1648_v31  ;;  %p3090_p13 = scmp.ge.s32.totalorder %s856_s6, %s2700_s15  ;;  %p3095_p12 = scmp.lt.s32.totalorder %s856_s6, %s2725_s26 }
  0xba   : >> { %v632_v28 = vpack.c.bf16 %v630_v43, %v630_v43  ;;  %v797_v50 = vunpack.c.l.bf16 %v785_v46  ;;  %v798_v54 = vunpack.c.l.bf16 %v786_v47  ;;  %v806_v51 = vstv %s3006_s2  ;;  %s741_s2 = scalar_select %p3034_p6, 1, 0 }
  0xbb   : >> { %v636_v56 = vsel %vm3008_vm7, %v631_v45, %v613_v25  ;;  %v1586_v58 = vunpack.c.h.bf16 %v2970_v15  ;;  %vm3064_vm13 = vcmp.eq.s32.totalorder %v657_v37, 1  ;;  %v3075_v62 = vadd.f32 %v503_v42, %v465_v40  ;;  %s3110_s30 = scalar_select %p836_p2, 0, 1 }
  0xbc   : >> { %v637_v3 = vsel %vm3008_vm7, %v632_v28, %v614_v57  ;;  %v648_v4 = vunpack.c.l.bf16 %v636_v56  ;;  %v801_v6 = vmax.f32 %v797_v50, %v1593_v44  ;;  %v802_v52 = vmax.f32 %v798_v54, %v1594_v48  ;;  %p859_p9 = pnand %p3095_p12, %p3090_p13  ;;  %p989_p0 = scmp.lt.s32.totalorder %s2801_s3, 9 }
  0xbd   : >> { %v649_v63 = vunpack.c.l.bf16 %v637_v3  ;;  %vm3081_vm14 = vcmp.eq.s32.totalorder %v806_v51, 1  ;;  %v1597_v59 = vunpack.c.l.bf16 %v3054_v55  ;;  %v3102_v9 = vstv %s678_s11  ;;  %p3224_p5 = scmp.ge.s32.totalorder %s879_s8, %s2700_s15  ;;  %p3877_p12 = scmp.le.s32.totalorder %s2227_s27, %s2165_s14 }
  0xbe   : >> { %v652_v7 = vmax.f32 %v648_v4, %v1585_v34  ;;  %v803_v10 = vpack.c.bf16 %v801_v6, %v801_v6  ;;  %v1598_v11 = vunpack.c.h.bf16 %v3054_v55  ;;  %v3115_v53 = vstv %s699_s18  ;;  %s3168_s0 = scalar_select %p989_p0, %s2801_s3, 9  ;;  %v3187_v55 = vld [vmem:[%s2912_s7 + $0x28] sm:$0xff]  }
  0xbf   : >> { %v653_v12 = vmax.f32 %v649_v63, %v1586_v58  ;;  %v804_v13 = vpack.c.bf16 %v802_v52, %v802_v52  ;;  %v829_v14 = vstv %s3073_s22  ;;  %v3121_v17 = vstv %s720_s25  ;;  %s3179_s5 = scalar_select %p859_p9, 0, 1 }
  0xc0   : >> { %v654_v15 = vpack.c.bf16 %v652_v7, %v652_v7  ;;  %v3125_v20 = vsel %vm3081_vm14, %v803_v10, %v785_v46  ;;  %v1601_v21 = vunpack.c.l.bf16 %v3087_v8  ;;  %v3128_v23 = vstv %s741_s2  ;;  %p991_p1 = scmp.ge.s32.totalorder %s3168_s0, %s2801_s3  ;;  %p992_p7 = scmp.lt.s32.totalorder %s3168_s0, %s2815_s24 }
  0xc1   : >> { %v655_v22 = vpack.c.bf16 %v653_v12, %v653_v12  ;;  %v3132_v24 = vsel %vm3081_vm14, %v804_v13, %v786_v47  ;;  %v1602_v25 = vunpack.c.h.bf16 %v3087_v8  ;;  %v820_v26 = vunpack.c.l.bf16 %v3125_v20  ;;  %s1538_s11 = sshll.u32 %s3168_s0, 3  ;;  %p882_p10 = pnand %p3229_p4, %p3224_p5 }
  0xc2   : >> { %v659_v57 = vsel %vm3064_vm13, %v654_v15, %v636_v56  ;;  %v821_v27 = vunpack.c.l.bf16 %v3132_v24  ;;  %vm3139_vm3 = vcmp.eq.s32.totalorder %v829_v14, 1  ;;  %v852_v31 = vstv %s3110_s30  ;;  %p3199_p8 = pnand %p992_p7, %p991_p1  ;;  %s3207_s29 = scalar_lea.vmem %s2121_s1, %s1538_s11 [#allocation8] }
  0xc3   : >> { %v660_v32 = vsel %vm3064_vm13, %v655_v22, %v637_v3  ;;  %v661_v33 = vsel %vm2469_vm1, %v659_v57, 4286644096  ;;  %v683_v34 = vsel %vm2526_vm6, %v659_v57, 4286644096  ;;  %v704_v35 = vsel %vm2613_vm5, %v659_v57, 4286644096  ;;  %p3878_p9 = scmp.le.s32.totalorder %s2725_s26, %s2700_s15 }
  0xc4   : >> { %v662_v36 = vsel %vm2479_vm2, %v660_v32, 4286644096  ;;  %v663_v37 = vunpack.c.l.bf16 %v661_v33  ;;  %v684_v38 = vsel %vm2574_vm12, %v660_v32, 4286644096  ;;  %v685_v39 = vunpack.c.l.bf16 %v683_v34  ;;  %s1503_s18 = scalar_select %p3199_p8, 0, 1 }
  0xc5   : >> { %v664_v40 = vunpack.c.l.bf16 %v662_v36  ;;  %v686_v42 = vunpack.c.l.bf16 %v684_v38  ;;  %v705_v43 = vsel %vm2660_vm0, %v660_v32, 4286644096  ;;  %v706_v44 = vunpack.c.l.bf16 %v704_v35  ;;  %s1028_s6 = sadd.s32 2, %s3168_s0  ;;  %p3302_p0 = por %p3878_p9, %p3877_p12 }
  0xc6   : >> { %vm3859_vm4 = vcmask 261120   ;;  %v707_v47 = vunpack.c.l.bf16 %v705_v43  ;;  %v725_v48 = vsel %vm2693_vm8, %v659_v57, 4286644096  ;;  %v726_v51 = vsel %vm2716_vm10, %v660_v32, 4286644096  ;;  %p3285_p2 = scmp.ge.s32.totalorder %s1028_s6, %s2801_s3  ;;  %p3290_p13 = scmp.lt.s32.totalorder %s1028_s6, %s2815_s24 }
  0xc7   : >> { %v665_v45 = vsel %vm3859_vm4, %v663_v37, -inf  ;;  %vm3860_vm9 = vmmov %vm3859_vm4  ;;  %v727_v3 = vunpack.c.l.bf16 %v725_v48  ;;  %v728_v6 = vunpack.c.l.bf16 %v726_v51  ;;  %v824_v63 = vmax.f32 %v820_v26, %v1597_v59  ;;  %v998_v48 = vld [vmem:[%s3207_s29] sm:$0xf]  ;;  %s3281_s19 = scalar_select %p882_p10, 0, 1 }
  0xc8   : >> { %v687_v46 = vsel %vm3860_vm9, %v685_v39, -inf  ;;  %vm3861_vm11 = vmmov %vm3859_vm4  ;;  %v825_v52 = vmax.f32 %v821_v27, %v1598_v11  ;;  %vm3195_vm14 = vcmp.eq.s32.totalorder %v852_v31, 1  ;;  %v1605_v13 = vunpack.c.l.bf16 %v3187_v55  ;;  %v3214_v31 = vld [vmem:[%s2912_s7 + $0x30] sm:$0xff]   ;;  %s1005_s7 = sadd.s32 1, %s3168_s0  ;;  %p1031_p7 = pnand %p3290_p13, %p3285_p2 }
  0xc9   : >> { %v666_v28 = vsel %vm3861_vm11, %v664_v40, -inf  ;;  %vm3862_vm7 = vmmov %vm3859_vm4  ;;  %v729_v12 = vsel %vm3859_vm4, %v727_v3, -inf  ;;  %v826_v14 = vpack.c.bf16 %v824_v63, %v824_v63  ;;  %v1606_v27 = vunpack.c.h.bf16 %v3187_v55  ;;  %p3265_p6 = scmp.ge.s32.totalorder %s1005_s7, %s2801_s3  ;;  %p3270_p3 = scmp.lt.s32.totalorder %s1005_s7, %s2815_s24 }
  0xca   : >> { %v688_v50 = vsel %vm3862_vm7, %v686_v42, -inf  ;;  %vm3863_vm15 = vmmov %vm3859_vm4  ;;  %v667_v56 = vmax.f32 %v665_v45, %v666_v28  ;;  %v827_v15 = vpack.c.bf16 %v825_v52, %v825_v52  ;;  %v875_v35 = vstv %s3179_s5  ;;  %v999_v28 = vld [vmem:[%s3207_s29 + $0x4] sm:$0xf]  ;;  %s919_s11 = scalar_select %p3302_p0, 1, 0 }
  0xcb   : >> { %v708_v54 = vsel %vm3863_vm15, %v706_v44, -inf  ;;  %v689_v58 = vmax.f32 %v687_v46, %v688_v50  ;;  %vm3864_vm13 = vmmov %vm3859_vm4  ;;  %v831_v33 = vsel %vm3139_vm3, %v826_v14, %v3125_v20  ;;  %v3234_v20 = vld [vmem:[%s3207_s29 + $0x8] sm:$0xff]   ;;  %vm680_vm11 = vcmp.eq.s32.totalorder %v3102_v9, 1  ;;  %p1008_p1 = pnand %p3270_p3, %p3265_p6  ;;  %p3882_p8 = scmp.le.s32.totalorder %s2248_s17, %s2234_s9 }
  0xcc   : >> { %v709_v61 = vsel %vm3864_vm13, %v707_v47, -inf  ;;  %v668_v7 = vrot.slane %v667_v56, 4  ;;  %vm3868_vm9 = vmmov %vm3859_vm4  ;;  %v832_v34 = vsel %vm3139_vm3, %v827_v15, %v3132_v24  ;;  %v843_v39 = vunpack.c.l.bf16 %v831_v33  ;;  %s3354_s8 = scalar_select %p1031_p7, 0, 1 }
  0xcd   : >> { %v710_v4 = vmax.f32 %v708_v54, %v709_v61  ;;  %v690_v10 = vrot.slane %v689_v58, 4  ;;  %v730_v11 = vsel %vm3868_vm9, %v728_v6, -inf  ;;  %vm701_vm3 = vcmp.eq.s32.totalorder %v3115_v53, 1  ;;  %s1507_s13 = scalar_select %p1008_p1, 0, 1 }
  0xce   : >> { %v669_v22 = vmax.f32 %v667_v56, %v668_v7  ;;  %v731_v26 = vmax.f32 %v729_v12, %v730_v11  ;;  %v844_v30 = vunpack.c.l.bf16 %v832_v34  ;;  %v1609_v40 = vunpack.c.l.bf16 %v3214_v31  ;;  %p3883_p5 = pmov %p3878_p9  ;;  %s1074_s22 = sadd.s32 4, %s3168_s0 }
  0xcf   : >> { %v711_v59 = vrot.slane %v710_v4, 4  ;;  %v691_v57 = vmax.f32 %v689_v58, %v690_v10  ;;  %v1001_v42 = vstv %s1503_s18  ;;  %v847_v46 = vmax.f32 %v843_v39, %v1601_v21  ;;  %s1051_s18 = sadd.s32 3, %s3168_s0  ;;  %p3893_p2 = scmp.le.s32.totalorder %s2294_s28, %s2289_s16 }
  0xd0   : >> { %v670_v36 = vrot.slane %v669_v22, 2  ;;  %v732_v38 = vrot.slane %v731_v26, 4  ;;  %vm3241_vm7 = vcmp.eq.s32.totalorder %v875_v35, 1  ;;  %vm722_vm15 = vcmp.eq.s32.totalorder %v3121_v17, 1  ;;  %p3368_p4 = por %p3883_p5, %p3882_p8  ;;  %p3391_p10 = scmp.ge.s32.totalorder %s1051_s18, %s2801_s3 }
  0xd1   : >> { %v712_v32 = vmax.f32 %v710_v4, %v711_v59  ;;  %v692_v37 = vrot.slane %v691_v57, 2  ;;  %v848_v54 = vmax.f32 %v844_v30, %v1602_v25  ;;  %vm1002_vm13 = vcmp.eq.s32.totalorder %v1001_v42, 1  ;;  %p3396_p6 = scmp.lt.s32.totalorder %s1051_s18, %s2815_s24  ;;  %p3894_p13 = pmov %p3883_p5 }
  0xd2   : >> { %v671_v43 = vmax.f32 %v669_v22, %v670_v36  ;;  %v733_v45 = vmax.f32 %v731_v26, %v732_v38  ;;  %v1613_v21 = vunpack.c.l.bf16 %v3234_v20  ;;  %v849_v61 = vpack.c.bf16 %v847_v46, %v847_v46  ;;  %s940_s6 = scalar_select %p3368_p4, 1, 0 }
  0xd3   : >> { %v713_v24 = vrot.slane %v712_v32, 2  ;;  %v693_v44 = vmax.f32 %v691_v57, %v692_v37  ;;  %vm743_vm4 = vcmp.eq.s32.totalorder %v3128_v23, 1  ;;  %v850_v8 = vpack.c.bf16 %v848_v54, %v848_v54  ;;  %p1054_p3 = pnand %p3396_p6, %p3391_p10  ;;  %p3429_p12 = por %p3894_p13, %p3893_p2 }
  0xd4   : >> { %v672_v51 = vrot.slane %v671_v43, 1  ;;  %v734_v58 = vrot.slane %v733_v45, 2  ;;  %v3257_v25 = vsel %vm1002_vm13, %v998_v48, 4286644096  ;;  %v3259_v4 = vsel %vm1002_vm13, %v999_v28, 4286644096  ;;  %p3436_p9 = scmp.ge.s32.totalorder %s1074_s22, %s2801_s3  ;;  %p3441_p0 = scmp.lt.s32.totalorder %s1074_s22, %s2815_s24 }
  0xd5   : >> { %v714_v50 = vmax.f32 %v712_v32, %v713_v24  ;;  %v694_v56 = vrot.slane %v693_v44, 1  ;;  %v854_v7 = vsel %vm3195_vm14, %v849_v61, %v831_v33  ;;  %v855_v12 = vsel %vm3195_vm14, %v850_v8, %v832_v34  ;;  %s3455_s30 = scalar_select %p1054_p3, 0, 1 }
  0xd6   : >> { %v673_v6 = vmax.f32 %v671_v43, %v672_v51  ;;  %v735_v52 = vmax.f32 %v733_v45, %v734_v58  ;;  %v866_v59 = vunpack.c.l.bf16 %v854_v7  ;;  %v1614_v11 = vunpack.c.h.bf16 %v3234_v20  ;;  %s961_s5 = scalar_select %p3429_p12, 1, 0 }
  0xd7   : >> { %v715_v3 = vrot.slane %v714_v50, 1  ;;  %v695_v63 = vmax.f32 %v693_v44, %v694_v56  ;;  %v867_v57 = vunpack.c.l.bf16 %v855_v12  ;;  %v1015_v32 = vunpack.c.l.bf16 %v3257_v25  ;;  %p1077_p1 = pnand %p3441_p0, %p3436_p9  ;;  %p3900_p7 = scmp.le.s32.totalorder %s2339_s20, %s2332_s21 }
  0xd8   : >> { %v674_v14 = vpack.c.bf16 %v673_v6, %v673_v6  ;;  %v736_v22 = vrot.slane %v735_v52, 1  ;;  %v870_v26 = vmax.f32 %v866_v59, %v1605_v13  ;;  %v1016_v33 = vunpack.c.l.bf16 %v3259_v4  ;;  %p3901_p8 = pmov %p3883_p5  ;;  %s1120_s10 = sadd.s32 6, %s3168_s0 }
  0xd9   : >> { %v716_v10 = vmax.f32 %v714_v50, %v715_v3  ;;  %v696_v15 = vpack.c.bf16 %v695_v63, %v695_v63  ;;  %v871_v37 = vmax.f32 %v867_v57, %v1606_v27  ;;  %v1610_v39 = vunpack.c.h.bf16 %v3214_v31  ;;  %v3339_v50 = vld [vmem:[%s3207_s29 + $0x10] sm:$0xff]   ;;  %s3485_s15 = scalar_select %p1077_p1, 0, 1 }
  0xda   : >> { %v677_v34 = vunpack.c.l.bf16 %v674_v14  ;;  %v737_v36 = vmax.f32 %v735_v52, %v736_v22  ;;  %v872_v38 = vpack.c.bf16 %v870_v26, %v870_v26  ;;  %v898_v20 = vstv %s3281_s19  ;;  %p3470_p5 = por %p3901_p8, %p3900_p7  ;;  %p3519_p3 = scmp.ge.s32.totalorder %s1120_s10, %s2801_s3 }
  0xdb   : >> { %v717_v0 = vpack.c.bf16 %v716_v10, %v716_v10  ;;  %v698_v35 = vunpack.c.l.bf16 %v696_v15  ;;  %v873_v55 = vpack.c.bf16 %v871_v37, %v871_v37  ;;  %v1019_v9 = vmax.f32 %v1015_v32, %v1613_v21  ;;  %p3524_p2 = scmp.lt.s32.totalorder %s1120_s10, %s2815_s24  ;;  %p3917_p12 = scmp.le.s32.totalorder %s2227_s27, %s2165_s14 }
  0xdc   : >> { %v681_v24 = vsel %vm680_vm11, 0.0, %v677_v34  ;;  %v738_v42 = vpack.c.bf16 %v737_v36, %v737_v36  ;;  %v877_v43 = vsel %vm3241_vm7, %v872_v38, %v854_v7  ;;  %v1020_v44 = vmax.f32 %v1016_v33, %v1614_v11  ;;  %s982_s18 = scalar_select %p3470_p5, 1, 0 }
  0xdd   : >> { %v719_v13 = vunpack.c.l.bf16 %v717_v0  ;;  %v702_v30 = vsel %vm701_vm3, 0.0, %v698_v35  ;;  %v682_v27 = vadd.f32 %v681_v24, %v3075_v62  ;;  %v878_v46 = vsel %vm3241_vm7, %v873_v55, %v855_v12  ;;  %p1123_p13 = pnand %p3524_p2, %p3519_p3  ;;  %p3577_p9 = por %p1157_p11, %p3917_p12 }
  0xde   : >> { %v740_v45 = vunpack.c.l.bf16 %v738_v42  ;;  %v889_v48 = vunpack.c.l.bf16 %v877_v43  ;;  %v890_v28 = vunpack.c.l.bf16 %v878_v46  ;;  %vm3345_vm14 = vcmp.eq.s32.totalorder %v898_v20, 1  ;;  %p3920_p0 = scmp.le.s32.totalorder %s2248_s17, %s2234_s9  ;;  %p3923_p7 = scmp.le.s32.totalorder %s2294_s28, %s2289_s16 }
  0xdf   : >> { %v723_v53 = vsel %vm722_vm15, 0.0, %v719_v13  ;;  %v703_v62 = vadd.f32 %v702_v30, %v682_v27  ;;  %v3356_v23 = vstv %s919_s11  ;;  %v1021_v56 = vpack.c.bf16 %v1019_v9, %v1019_v9  ;;  %s1160_s14 = scalar_select %p3577_p9, 1, 0 }
  0xe0   : >> { %v744_v17 = vsel %vm743_vm4, 0.0, %v740_v45  ;;  %v893_v47 = vmax.f32 %v889_v48, %v1609_v40  ;;  %v894_v51 = vmax.f32 %v890_v28, %v1610_v39  ;;  %v1022_v61 = vpack.c.bf16 %v1020_v44, %v1020_v44  ;;  %v1655_v48 = vld [vmem:[%s3207_s29 + $0x18] sm:$0xff]   ;;  %p3588_p1 = por %p1157_p11, %p3920_p0  ;;  %p3599_p8 = por %p1157_p11, %p3923_p7 }
  0xe1   : >> { %v724_v21 = vadd.f32 %v723_v53, %v703_v62  ;;  %v1024_v3 = vstv %s1507_s13  ;;  %v1617_v31 = vunpack.c.l.bf16 %v3339_v50  ;;  %v1618_v6 = vunpack.c.h.bf16 %v3339_v50  ;;  %s1097_s13 = sadd.s32 5, %s3168_s0  ;;  %p3925_p5 = scmp.le.s32.totalorder %s2339_s20, %s2332_s21 }
  0xe2   : >> { %v895_v58 = vpack.c.bf16 %v893_v47, %v893_v47  ;;  %v896_v8 = vpack.c.bf16 %v894_v51, %v894_v51  ;;  %vm1025_vm9 = vcmp.eq.s32.totalorder %v1024_v3, 1  ;;  %v1047_v10 = vstv %s3354_s8  ;;  %p3488_p4 = scmp.ge.s32.totalorder %s1097_s13, %s2801_s3  ;;  %p3493_p10 = scmp.lt.s32.totalorder %s1097_s13, %s2815_s24 }
  0xe3   : >> { %v3360_v40 = vadd.f32 %v744_v17, %v724_v21  ;;  %v3376_v52 = vsel %vm1025_vm9, %v1021_v56, %v3257_v25  ;;  %v3379_v7 = vsel %vm1025_vm9, %v1022_v61, %v3259_v4  ;;  %vm3887_vm11 = vcmask 261120   ;;  %s1181_s27 = scalar_select %p3588_p1, 1, 0 }
  0xe4   : >> { %v900_v63 = vsel %vm3345_vm14, %v895_v58, %v877_v43  ;;  %v901_v12 = vsel %vm3345_vm14, %v896_v8, %v878_v46  ;;  %vm3888_vm3 = vmmov %vm3887_vm11  ;;  %v1038_v43 = vunpack.c.l.bf16 %v3376_v52  ;;  %v1039_v9 = vunpack.c.l.bf16 %v3379_v7  ;;  %p1100_p6 = pnand %p3493_p10, %p3488_p4  ;;  %p3613_p4 = por %p1157_p11, %p3925_p5 }
  0xe5   : >> { %v902_v59 = vsel %vm2469_vm1, %v900_v63, 4286644096  ;;  %v924_v11 = vsel %vm2526_vm6, %v900_v63, 4286644096  ;;  %v945_v14 = vsel %vm2613_vm5, %v900_v63, 4286644096  ;;  %vm3889_vm7 = vmmov %vm3888_vm3  ;;  %v3445_v45 = vstv %s940_s6 }
  0xe6   : >> { %v903_v25 = vsel %vm2479_vm2, %v901_v12, 4286644096  ;;  %v904_v4 = vunpack.c.l.bf16 %v902_v59  ;;  %v925_v15 = vsel %vm2574_vm12, %v901_v12, 4286644096  ;;  %v926_v22 = vunpack.c.l.bf16 %v924_v11  ;;  %vm3890_vm15 = vmmov %vm3888_vm3  ;;  %s1523_s7 = scalar_select %p1100_p6, 0, 1 }
  0xe7   : >> { %v905_v57 = vunpack.c.l.bf16 %v903_v25  ;;  %v927_v0 = vunpack.c.l.bf16 %v925_v15  ;;  %v946_v26 = vsel %vm2660_vm0, %v901_v12, 4286644096  ;;  %v947_v32 = vunpack.c.l.bf16 %v945_v14  ;;  %vm3891_vm13 = vmmov %vm3888_vm3  ;;  %v1656_v15 = vld [vmem:[%s3207_s29 + $0x20] sm:$0xff]   ;;  %s1527_s6 = scalar_select %p1123_p13, 0, 1 }
  0xe8   : >> { %v906_v33 = vsel %vm3887_vm11, %v904_v4, -inf  ;;  %v928_v34 = vsel %vm3888_vm3, %v926_v22, -inf  ;;  %v948_v35 = vunpack.c.l.bf16 %v946_v26  ;;  %v966_v36 = vsel %vm2693_vm8, %v900_v63, 4286644096  ;;  %vm3892_vm4 = vmmov %vm3888_vm3  ;;  %s1202_s16 = scalar_select %p3599_p8, 1, 0 }
  0xe9   : >> { %v907_v37 = vsel %vm3889_vm7, %v905_v57, -inf  ;;  %v929_v13 = vsel %vm3890_vm15, %v927_v0, -inf  ;;  %v949_v38 = vsel %vm3891_vm13, %v947_v32, -inf  ;;  %v967_v39 = vsel %vm2716_vm10, %v901_v12, 4286644096  ;;  %vm3898_vm14 = vmmov %vm3888_vm3  ;;  %s3927_s21 = scalar_lea.vmem [#allocation11], %s2130_s12 }
  0xea   : >> { %v908_v20 = vmax.f32 %v906_v33, %v907_v37  ;;  %v930_v24 = vmax.f32 %v928_v34, %v929_v13  ;;  %v950_v30 = vsel %vm3892_vm4, %v948_v35, -inf  ;;  %v968_v42 = vunpack.c.l.bf16 %v966_v36  ;;  %vm3899_vm9 = vmmov %vm3888_vm3  ;;  %s1223_s28 = scalar_select %p3613_p4, 1, 0 }
  0xeb   : >> { %v951_v55 = vmax.f32 %v949_v38, %v950_v30  ;;  %v969_v27 = vunpack.c.l.bf16 %v967_v39  ;;  %v1042_v50 = vmax.f32 %v1038_v43, %v1617_v31  ;;  %v1043_v17 = vmax.f32 %v1039_v9, %v1618_v6  ;;  %s1229_s20 = scalar_lea.vmem %s3927_s21, %s1940_s23 [#allocation11]  ;;  %s188_s23 = sadd.s32 1, %s1940_s23  }
  0xec   : >> { %v909_v44 = vrot.slane %v908_v20, 4  ;;  %v931_v53 = vrot.slane %v930_v24, 4  ;;  %v970_v46 = vsel %vm3898_vm14, %v968_v42, -inf  ;;  %vm1048_vm11 = vcmp.eq.s32.totalorder %v1047_v10, 1  ;;  %p185_p11 = scmp.ge.s32.totalorder %s188_s23, 8  }
  0xed   : >> { %v952_v62 = vrot.slane %v951_v55, 4  ;;  %v971_v28 = vsel %vm3899_vm9, %v969_v27, -inf  ;;  %v1044_v56 = vpack.c.bf16 %v1042_v50, %v1042_v50  ;;  %v1045_v58 = vpack.c.bf16 %v1043_v17, %v1043_v17  ;;  %s3928_s3 = sld [smem:[#allocation23_spill]] (%p185_p11) }
  0xee   : >> { %v910_v47 = vmax.f32 %v908_v20, %v909_v44  ;;  %v932_v54 = vmax.f32 %v930_v24, %v931_v53  ;;  %v972_v21 = vmax.f32 %v970_v46, %v971_v28  ;;  %v1621_v61 = vunpack.c.l.bf16 %v1655_v48  ;;  %s3930_s4 = sld [smem:[#allocation30_spill]] (%p185_p11) }
  0xef   : >> { %v953_v51 = vmax.f32 %v951_v55, %v952_v62  ;;  %v1622_v6 = vunpack.c.h.bf16 %v1655_v48  ;;  %vm921_vm3 = vcmp.eq.s32.totalorder %v3356_v23, 1  ;;  %v1049_v10 = vsel %vm1048_vm11, %v1044_v56, %v3376_v52  ;;  %s3933_s11 = sld [smem:[#allocation27_spill]] (%p185_p11) }
  0xf0   : >> { %v911_v3 = vrot.slane %v910_v47, 2  ;;  %v933_v31 = vrot.slane %v932_v54, 2  ;;  %v973_v8 = vrot.slane %v972_v21, 4  ;;  %v1050_v12 = vsel %vm1048_vm11, %v1045_v58, %v3379_v7 }
  0xf1   : >> { %v954_v63 = vrot.slane %v953_v51, 2  ;;  %v1070_v59 = vstv %s3455_s30  ;;  %v1061_v4 = vunpack.c.l.bf16 %v1049_v10  ;;  %vm942_vm7 = vcmp.eq.s32.totalorder %v3445_v45, 1 }
  0xf2   : >> { %v912_v11 = vmax.f32 %v910_v47, %v911_v3  ;;  %v934_v14 = vmax.f32 %v932_v54, %v933_v31  ;;  %v974_v25 = vmax.f32 %v972_v21, %v973_v8  ;;  %v962_v57 = vstv %s961_s5  ;;  %s3932_s5 = sld [smem:[#allocation18_spill]] (%p185_p11) }
  0xf3   : >> { %v955_v22 = vmax.f32 %v953_v51, %v954_v63  ;;  %v1062_v0 = vunpack.c.l.bf16 %v1050_v12  ;;  %v1065_v32 = vmax.f32 %v1061_v4, %v1621_v61  ;;  %vm3499_vm15 = vcmp.eq.s32.totalorder %v1070_v59, 1  ;;  %v1657_v51 = vld [vmem:[%s3207_s29 + $0x28] sm:$0xff]   ;;  %s3929_s24 = sshll.u32 (%p185_p11), %s3928_s3, 3 }
  0xf4   : >> { %v913_v52 = vrot.slane %v912_v11, 1  ;;  %v935_v7 = vrot.slane %v934_v14, 1  ;;  %v975_v26 = vrot.slane %v974_v25, 2  ;;  %v1625_v36 = vunpack.c.l.bf16 %v1656_v15  ;;  %s3931_s30 = smov (%p185_p11), %s3930_s4  ;;  %s1243_s13 = scalar_lea.hbm (%p185_p11), %s3930_s4, %s3929_s24 }
  0xf5   : >> { %v956_v33 = vrot.slane %v955_v22, 1  ;;  %v1066_v34 = vmax.f32 %v1062_v0, %v1622_v6  ;;  %v1067_v39 = vpack.c.bf16 %v1065_v32, %v1065_v32  ;;  %v1626_v30 = vunpack.c.h.bf16 %v1656_v15  ;;  %s1246_s8 = sshll.u32 (%p185_p11), %s1243_s13, 4  ;;  %p3936_p6 = scmp.ne.s32.totalorder (%p185_p11), %s3933_s11, 0  ;;  %s1247_s8 = int_to_ptr.hbm [resolvable:$true] %s1246_s8 }
  0xf6   : >> { %v914_v37 = vmax.f32 %v912_v11, %v913_v52  ;;  %v936_v13 = vmax.f32 %v934_v14, %v935_v7  ;;  %v976_v38 = vmax.f32 %v974_v25, %v975_v26  ;;  %v1093_v42 = vstv %s3485_s15  ;;  %s3934_s15 = scalar_lea.vmem (%p185_p11), [#allocation11], %s2130_s12  ;;  %s1854_s0 = sshra.s32 (%p185_p11), %s1247_s8, 4  ;;  %s1855_s0 = int_to_ptr.hbm [resolvable:$true] %s1854_s0 }
  0xf7   : >> { %v957_v20 = vmax.f32 %v955_v22, %v956_v33  ;;  %v1068_v24 = vpack.c.bf16 %v1066_v34, %v1066_v34  ;;  %v1072_v9 = vsel %vm3499_vm15, %v1067_v39, %v1049_v10  ;;  %v983_v53 = vstv %s982_s18  ;;  %s1244_s26 = sshll.u32 (%p185_p11), %s3934_s15, 4  ;;  %s1856_s23 = scalar_lea.hbm (%p185_p11), %s1855_s0, 8  ;;  %s1245_s26 = int_to_ptr.vmem [resolvable:$true] %s1244_s26 }
  0xf8   : >> { %v915_v55 = vpack.c.bf16 %v914_v37, %v914_v37  ;;  %v937_v27 = vpack.c.bf16 %v936_v13, %v936_v13  ;;  %v977_v43 = vrot.slane %v976_v38, 1  ;;  %v1084_v48 = vunpack.c.l.bf16 %v1072_v9  ;;  %s3935_s18 = sand.u32 (%p185_p11), 1, %s3932_s5   ;;  %p1857_p10 = scmp.ne.s32.totalorder (%p185_p11), %s1855_s0, %s1856_s23 }
  0xf9   : >> { %v958_v44 = vpack.c.bf16 %v957_v20, %v957_v20  ;;  %v1073_v46 = vsel %vm3499_vm15, %v1068_v24, %v1050_v12  ;;  %vm963_vm13 = vcmp.eq.s32.totalorder %v962_v57, 1  ;;  %vm3513_vm4 = vcmp.eq.s32.totalorder %v1093_v42, 1  ;;  %v1658_v57 = vld [vmem:[%s3207_s29 + $0x30] sm:$0xff]   ;;  %s1233_s10 = scalar_lea.sflag (%p185_p11), [#allocation10], %s3935_s18  ;;  %p1861_p13 = scmp.lt.s32.totalorder (%p185_p11), %s1855_s0, %s3931_s30 }
  0xfa   : >> { %v918_v62 = vunpack.c.l.bf16 %v915_v55  ;;  %v939_v28 = vunpack.c.l.bf16 %v937_v27  ;;  %v978_v50 = vmax.f32 %v976_v38, %v977_v43  ;;  %v1085_v17 = vunpack.c.l.bf16 %v1073_v46  ;;  %p1858_p3 = pnand (%p185_p11), %p1857_p10, %p3936_p6 }
  0xfb   : >> { %v960_v47 = vunpack.c.l.bf16 %v958_v44  ;;  %v1088_v54 = vmax.f32 %v1084_v48, %v1625_v36  ;;  %vm984_vm14 = vcmp.eq.s32.totalorder %v983_v53, 1  ;;  %v1629_v10 = vunpack.c.l.bf16 %v1657_v51 }
  0xfc   : >> { %v922_v56 = vsel %vm921_vm3, 0.0, %v918_v62  ;;  %v943_v58 = vsel %vm942_vm7, 0.0, %v939_v28  ;;  %v979_v61 = vpack.c.bf16 %v978_v50, %v978_v50  ;;  %v1089_v3 = vmax.f32 %v1085_v17, %v1626_v30  ;;  %p1859_p2 = pneg (%p185_p11), %p1858_p3 }
  0xfd   : >> { %v923_v31 = vadd.f32 %v922_v56, %v3360_v40  ;;  %v1090_v8 = vpack.c.bf16 %v1088_v54, %v1088_v54  ;;  %v964_v6 = vsel %vm963_vm13, 0.0, %v960_v47  ;;  %v1630_v59 = vunpack.c.h.bf16 %v1657_v51 }
  0xfe   : >> { %v981_v63 = vunpack.c.l.bf16 %v979_v61  ;;  %v1091_v23 = vpack.c.bf16 %v1089_v3, %v1089_v3  ;;  %v1116_v25 = vstv %s1523_s7  ;;  %v1633_v32 = vunpack.c.l.bf16 %v1658_v57  ;;  %s1860_s7 = scalar_lea.hbm (%p185_p11), %s3931_s30, 16 }
  0xff   : >> { %v944_v12 = vadd.f32 %v943_v58, %v923_v31  ;;  %v1095_v45 = vsel %vm3513_vm4, %v1090_v8, %v1072_v9  ;;  %vm1117_vm9 = vcmp.eq.s32.totalorder %v1116_v25, 1  ;;  %v1634_v34 = vunpack.c.h.bf16 %v1658_v57  ;;  %p1862_p12 = scmp.lt.s32.totalorder (%p185_p11), %s1860_s7, %s1856_s23 }
 0x100   : >> { %v985_v11 = vsel %vm984_vm14, 0.0, %v981_v63  ;;  %v1096_v14 = vsel %vm3513_vm4, %v1091_v23, %v1073_v46  ;;  %v1107_v40 = vunpack.c.l.bf16 %v1095_v45  ;;  %v1139_v37 = vstv %s1527_s6 }
 0x101   : >> { %v965_v4 = vadd.f32 %v964_v6, %v944_v12  ;;  %v1108_v15 = vunpack.c.l.bf16 %v1096_v14  ;;  %vm1140_vm11 = vcmp.eq.s32.totalorder %v1139_v37, 1  ;;  %vm1230_vm4 = vcmask 253952   ;;  %p1863_p9 = por (%p185_p11), %p1862_p12, %p1861_p13 }
 0x102   : >> { %v1111_v22 = vmax.f32 %v1107_v40, %v1629_v10 }
 0x103   : >> { %v3547_v0 = vadd.f32 %v985_v11, %v965_v4  ;;  %v1112_v52 = vmax.f32 %v1108_v15, %v1630_v59  ;;  %p1864_p0 = pnand (%p185_p11), %p1863_p9, %p1859_p2 }
 0x104   : >> { %v1113_v7 = vpack.c.bf16 %v1111_v22, %v1111_v22 }
 0x105   : >> { %v1114_v26 = vpack.c.bf16 %v1112_v52, %v1112_v52  ;;  %v1161_v52 = vstv %s1160_s14 }
 0x106   : >> { %v1118_v33 = vsel %vm1117_vm9, %v1113_v7, %v1095_v45  ;;  %vm1162_vm3 = vcmp.eq.s32.totalorder %v1161_v52, 1 }
 0x107   : >> { %v1119_v35 = vsel %vm1117_vm9, %v1114_v26, %v1096_v14  ;;  %v1130_v36 = vunpack.c.l.bf16 %v1118_v33 }
 0x108   : >> { %v1131_v13 = vunpack.c.l.bf16 %v1119_v35 }
 0x109   : >> { %v1134_v38 = vmax.f32 %v1130_v36, %v1633_v32 }
 0x10a   : >> { %v1135_v39 = vmax.f32 %v1131_v13, %v1634_v34  ;;  %v1203_v13 = vstv %s1202_s16 }
 0x10b   : >> { %v1136_v20 = vpack.c.bf16 %v1134_v38, %v1134_v38  ;;  %vm1204_vm15 = vcmp.eq.s32.totalorder %v1203_v13, 1 }
 0x10c   : >> { %v1137_v24 = vpack.c.bf16 %v1135_v39, %v1135_v39 }
 0x10d   : >> { %v1141_v30 = vsel %vm1140_vm11, %v1136_v20, %v1118_v33  ;;  %v1182_v33 = vstv %s1181_s27 }
 0x10e   : >> { %v1142_v42 = vsel %vm1140_vm11, %v1137_v24, %v1119_v35  ;;  %v1143_v55 = vsel %vm2469_vm1, %v1141_v30, 4286644096  ;;  %v1165_v27 = vsel %vm2526_vm6, %v1141_v30, 4286644096  ;;  %v1186_v43 = vsel %vm2613_vm5, %v1141_v30, 4286644096 }
 0x10f   : >> { %v1144_v9 = vsel %vm2479_vm2, %v1142_v42, 4286644096  ;;  %v1145_v44 = vunpack.c.l.bf16 %v1143_v55  ;;  %v1166_v53 = vsel %vm2574_vm12, %v1142_v42, 4286644096  ;;  %v1167_v46 = vunpack.c.l.bf16 %v1165_v27 }
 0x110   : >> { %v1146_v48 = vunpack.c.l.bf16 %v1144_v9  ;;  %v1168_v62 = vunpack.c.l.bf16 %v1166_v53  ;;  %v1187_v18 = vsel %vm2660_vm0, %v1142_v42, 4286644096  ;;  %v1188_v28 = vunpack.c.l.bf16 %v1186_v43 }
 0x111   : >> { %vm3911_vm1 = vcmask 261120   ;;  %v1189_v49 = vunpack.c.l.bf16 %v1187_v18  ;;  %v1207_v41 = vsel %vm2693_vm8, %v1141_v30, 4286644096  ;;  %v1208_v47 = vsel %vm2716_vm10, %v1142_v42, 4286644096 }
 0x112   : >> { %v1147_v29 = vsel %vm3911_vm1, %v1145_v44, -inf  ;;  %vm3912_vm6 = vmmov %vm3911_vm1  ;;  %v1209_v51 = vunpack.c.l.bf16 %v1207_v41  ;;  %v1210_v58 = vunpack.c.l.bf16 %v1208_v47  ;;  %vm1183_vm7 = vcmp.eq.s32.totalorder %v1182_v33, 1 }
 0x113   : >> { %v1169_v19 = vsel %vm3912_vm6, %v1167_v46, -inf  ;;  %vm3913_vm2 = vmmov %vm3911_vm1  ;;  %v1224_v42 = vstv %s1223_s28 }
 0x114   : >> { %v1148_v60 = vsel %vm3913_vm2, %v1146_v48, -inf  ;;  %vm3914_vm12 = vmmov %vm3911_vm1  ;;  %vm1225_vm13 = vcmp.eq.s32.totalorder %v1224_v42, 1 }
 0x115   : >> { %v1170_v50 = vsel %vm3914_vm12, %v1168_v62, -inf  ;;  %vm3915_vm5 = vmmov %vm3911_vm1  ;;  %v1149_v54 = vmax.f32 %v1147_v29, %v1148_v60 }
 0x116   : >> { %v1190_v17 = vsel %vm3915_vm5, %v1188_v28, -inf  ;;  %v1171_v21 = vmax.f32 %v1169_v19, %v1170_v50  ;;  %vm3916_vm0 = vmmov %vm3911_vm1 }
 0x117   : >> { %v1191_v5 = vsel %vm3916_vm0, %v1189_v49, -inf  ;;  %v1150_v61 = vrot.slane %v1149_v54, 4  ;;  %vm3919_vm8 = vmmov %vm3916_vm0 }
 0x118   : >> { %v1192_v56 = vmax.f32 %v1190_v17, %v1191_v5  ;;  %v1172_v16 = vrot.slane %v1171_v21, 4  ;;  %v1211_v3 = vsel %vm3919_vm8, %v1209_v51, -inf  ;;  %vm3922_vm10 = vmmov %vm3916_vm0 }
 0x119   : >> { %v1212_v8 = vsel %vm3922_vm10, %v1210_v58, -inf  ;;  %v1151_v6 = vmax.f32 %v1149_v54, %v1150_v61 }
 0x11a   : >> { %v1193_v31 = vrot.slane %v1192_v56, 4  ;;  %v1173_v63 = vmax.f32 %v1171_v21, %v1172_v16  ;;  %v1213_v23 = vmax.f32 %v1211_v3, %v1212_v8 }
 0x11b   : >> { %v1152_v12 = vrot.slane %v1151_v6, 2 }
 0x11c   : >> { %v1194_v10 = vmax.f32 %v1192_v56, %v1193_v31  ;;  %v1174_v45 = vrot.slane %v1173_v63, 2  ;;  %v1214_v59 = vrot.slane %v1213_v23, 4 }
 0x11d   : >> { %v1153_v14 = vmax.f32 %v1151_v6, %v1152_v12 }
 0x11e   : >> { %v1195_v11 = vrot.slane %v1194_v10, 2  ;;  %v1175_v40 = vmax.f32 %v1173_v63, %v1174_v45  ;;  %v1215_v25 = vmax.f32 %v1213_v23, %v1214_v59 }
 0x11f   : >> { %v1154_v15 = vrot.slane %v1153_v14, 1 }
 0x120   : >> { %v1196_v4 = vmax.f32 %v1194_v10, %v1195_v11  ;;  %v1176_v22 = vrot.slane %v1175_v40, 1  ;;  %v1216_v57 = vrot.slane %v1215_v25, 2 }
 0x121   : >> { %v1155_v26 = vmax.f32 %v1153_v14, %v1154_v15 }
 0x122   : >> { %v1197_v7 = vrot.slane %v1196_v4, 1  ;;  %v1177_v32 = vmax.f32 %v1175_v40, %v1176_v22  ;;  %v1217_v34 = vmax.f32 %v1215_v25, %v1216_v57 }
 0x123   : >> { %v1156_v36 = vpack.c.bf16 %v1155_v26, %v1155_v26 }
 0x124   : >> { %v1198_v35 = vmax.f32 %v1196_v4, %v1197_v7  ;;  %v1178_v37 = vpack.c.bf16 %v1177_v32, %v1177_v32  ;;  %v1218_v38 = vrot.slane %v1217_v34, 1 }
 0x125   : >> { %v1159_v20 = vunpack.c.l.bf16 %v1156_v36 }
 0x126   : >> { %v1199_v39 = vpack.c.bf16 %v1198_v35, %v1198_v35  ;;  %v1180_v24 = vunpack.c.l.bf16 %v1178_v37  ;;  %v1219_v30 = vmax.f32 %v1217_v34, %v1218_v38 }
 0x127   : >> { %v1163_v27 = vsel %vm1162_vm3, 0.0, %v1159_v20 }
 0x128   : >> { %v1201_v55 = vunpack.c.l.bf16 %v1199_v39  ;;  %v1184_v43 = vsel %vm1183_vm7, 0.0, %v1180_v24  ;;  %v1220_v9 = vpack.c.bf16 %v1219_v30, %v1219_v30  ;;  %v1164_v44 = vadd.f32 %v1163_v27, %v3547_v0 }
 0x12a   : >> { %v1205_v53 = vsel %vm1204_vm15, 0.0, %v1201_v55  ;;  %v1222_v46 = vunpack.c.l.bf16 %v1220_v9  ;;  %v1185_v48 = vadd.f32 %v1184_v43, %v1164_v44 }
 0x12c   : >> { %v1226_v62 = vsel %vm1225_vm13, 0.0, %v1222_v46  ;;  %v1206_v18 = vadd.f32 %v1205_v53, %v1185_v48 }
 0x12e   : >> { %v1227_v28 = vadd.f32 %v1226_v62, %v1206_v18  ;;  %187 = sbr.rel (!%p185_p11) target bundleno = 82 (0x52), region = 105 }
 0x130   : >> { %v1228_v29 = vmul.f32 0.0625, %v1227_v28 }
 0x132   : >> { %1231 = vst.msk [vmem:[%s1229_s20] sm:$0x1] %vm1230_vm4, %v1228_v29 }
 0x133   : > { %1867 = shalt.err (!%p1864_p0)
}
 0x134   : > { %s1949_s12 = smov 16   ;;  %s1950_s22 = smov 1  }
 0x135   : > { %1663 = dma.vmem_to_hbm [thread:$0]  (%p3936_p6), %s1245_s26, 128, %s1247_s8, %s1233_s10, %s1949_s12, %s1949_s12, %s1950_s22  }
 0x136 PF: > { %s3937_s17 = sld [smem:[#allocation17_spill]] }
 0x137   : > { %s3938_s14 = sld [smem:[#allocation28_spill]] }
 0x138   : > { %s3939_s27 = sld [smem:[#allocation22_spill]] }
 0x13c   : > { %s1261_s9 = sand.u32 1, %s3937_s17  }
 0x13d   : > { %p3940_p1 = scmp.ne.s32.totalorder %s3938_s14, 0  ;;  %s1262_s16 = scalar_lea.sflag [#allocation10], %s1261_s9 }
 0x13e   : > { %p3941_p7 = scmp.ge.s32.totalorder %s3939_s27, 2 }
 0x140   : > { %p1672_p8 = pnand %p3941_p7, %p3940_p1 }
 0x142   : > { %p1673_p5 = pneg %p1672_p8 }
 0x144   : > { %1907 = dma.done.wait (%p1673_p5), %s1262_s16, 128  }
 0x145   : > { %1909 = vsyncadd (%p1673_p5), %s1262_s16, 4294967168  ;;  %s3942_s18 = sld [smem:[#allocation24_spill]] }
 0x146   : > { %s3943_s2 = sld [smem:[#allocation18_spill]] }
 0x147   : > { %s3944_s3 = sld [smem:[#allocation19_spill]] }
 0x148   : > { %s3945_s15 = sld [smem:[#allocation25_spill]] }
 0x149   : > { %s3946_s16 = sld [smem:[#allocation20_spill]] }
 0x14a   : > { %s3947_s17 = sld [smem:[#allocation21_spill]] }
 0x14b   : > { %s3948_s4 = sld [smem:[#allocation26_spill]]  ;;  %p47_p4 = scmp.ge.s32.totalorder %s3942_s18, 4  }
 0x14d   :  { %49 = sbr.rel (!%p47_p4) target bundleno = 21 (0x15), region = 116 }
 0x152   :  { %1268 = vsyncpa [#allocation9], 1 }
 0x153   :  { %1270 = vsyncpa [#allocation9 + $0x1], 1 }
 0x154   :  { %1271 = vsyncpa [#allocation10], 1 }
 0x155   :  { %1273 = vsyncpa [#allocation10 + $0x1], 1 }

</bundles_post_ra>
